<compile_context>
chip_gen: v5e
topology: v5e:2x2
jax: 0.10.0
libtpu: 0.0.40
codegen_flags: <defaults>
</compile_context>

<pallas_src>
import functools

import jax
import jax.numpy as jnp
from jax import lax
from jax.experimental import pallas as pl
from jax.experimental.pallas import tpu as pltpu

# Above every generation's default scoped-VMEM limit (v5e 16 MiB), comfortably
# below v7x's 64 MiB physical.  Our per-tile working set at tile_v<=2048 is a
# few MiB (the lane-padded (tile_v,1) int32 ids blocks are the hidden consumer).
_VMEM_LIMIT_BYTES = 40 * 1024 * 1024


# ---------------------------------------------------------------------------
# Pass A: single-pass online per-graph softmax-weighted sum (tiled over nodes)
# ---------------------------------------------------------------------------
def _segment_softmax_kernel(
    ids_ref,      # [TV, 1] int32  node -> graph id (sentinel >= G for padded rows)
    h_ref,        # [TV, D] f32    flattened node embeddings (mean taken in-kernel)
    wproj_ref,    # [F, H+Gf]      fused [scoring | transformation] weights (mx dtype)
    bproj_ref,    # [1, H+Gf] f32  fused biases
    hexp_ref,     # [H, Gf]  f32   head -> feature-block expansion (0/1 kron matrix)
    out_ref,      # [G, Gf]  f32   per-graph weighted-sum representation
    m_sc,         # [H, G]   f32   running per-graph / per-head score max
    l_sc,         # [H, G]   f32   running softmax denominators
    acc_sc,       # [G, Gf]  f32   running weighted numerators
    *,
    num_heads: int,
    num_graphs: int,
    num_in_heads: int,
    mx_dtype,
):
    H, G, Hin = num_heads, num_graphs, num_in_heads
    TV, D = h_ref.shape
    F = wproj_ref.shape[0]
    i = pl.program_id(0)
    nt = pl.num_programs(0)

    @pl.when(i == 0)
    def _init():
        m_sc[...] = jnp.full_like(m_sc, -1e30)
        l_sc[...] = jnp.zeros_like(l_sc)
        acc_sc[...] = jnp.zeros_like(acc_sc)

    ids = ids_ref[...]                                                    # [TV, 1]
    valid = ids < G                                                       # [TV, 1] bool
    onehot_b = lax.broadcasted_iota(jnp.int32, (TV, G), 1) == ids         # [TV, G] bool
    onehot_f = onehot_b.astype(jnp.float32)
    onehot_mx = onehot_b.astype(mx_dtype)
    hexp_f = hexp_ref[...]                                                # [H, Gf] f32

    # In-kernel mean over the Hin input heads: a few VPU adds on lane blocks,
    # free under the DMA of the h tile (no separate x_mean HBM array).
    h = h_ref[...]                                                        # [TV, D] f32
    xm = h[:, 0:F]
    for k in range(1, Hin):
        xm = xm + h[:, k * F:(k + 1) * F]
    xm = xm * (1.0 / Hin)                                                 # [TV, F]

    # Fused scoring + transformation projection: one MXU pass.
    proj = jnp.dot(xm.astype(mx_dtype), wproj_ref[...].astype(mx_dtype),
                   preferred_element_type=jnp.float32) + bproj_ref[...]   # [TV, H+Gf]
    scores = proj[:, :H]                                                  # [TV, H]
    values = proj[:, H:]                                                  # [TV, Gf]

    # ---- online (flash-style) segment softmax update -----------------------
    m_old = m_sc[...]                                                     # [H, G]
    for hh in range(H):                       # H is small & static -> unrolled
        col = scores[:, hh:hh + 1]                                        # [TV, 1]
        masked = jnp.where(onehot_b, col, -1e30)                          # [TV, G]
        m_sc[hh:hh + 1, :] = jnp.maximum(
            m_old[hh:hh + 1, :], jnp.max(masked, axis=0, keepdims=True))
    m_new = m_sc[...]                                                     # [H, G]
    alpha = jnp.exp(m_old - m_new)                                        # [H, G]

    # Lift per-graph/per-head max back to nodes (f32; tiny matmul).
    m_node = jnp.einsum("vg,hg->vh", onehot_f, m_new,
                        preferred_element_type=jnp.float32)               # [TV, H]
    # Zero the numerator explicitly on padded rows so a large scoring bias can
    # never overflow through the sentinel path.
    shifted = jnp.where(valid, scores - m_node, -1e30)
    num = jnp.exp(shifted)                                                # [TV, H]

    # Denominators (rescale old, add this tile's segment sum).
    l_sc[...] = alpha * l_sc[...] + jnp.einsum(
        "vh,vg->hg", num.astype(mx_dtype), onehot_mx,
        preferred_element_type=jnp.float32)                               # [H, G]

    # Expand per-head weights to the per-feature blocks and accumulate.
    w_exp = jnp.dot(num.astype(mx_dtype), hexp_f.astype(mx_dtype),
                    preferred_element_type=jnp.float32)                   # [TV, Gf]
    weighted = (w_exp * values).astype(mx_dtype)                          # [TV, Gf]
    alpha_exp = jnp.einsum("hg,hf->gf", alpha, hexp_f,
                           preferred_element_type=jnp.float32)            # [G, Gf]
    acc_sc[...] = alpha_exp * acc_sc[...] + jnp.einsum(
        "vg,vf->gf", onehot_mx, weighted,
        preferred_element_type=jnp.float32)                               # [G, Gf]

    @pl.when(i == nt - 1)
    def _finalize():
        denom = jnp.einsum("hg,hf->gf", l_sc[...], hexp_f,
                           preferred_element_type=jnp.float32)            # [G, Gf]
        # Clamp so empty graphs yield 0 instead of NaN.
        out_ref[...] = acc_sc[...] / jnp.maximum(denom, 1e-30)


# ---------------------------------------------------------------------------
# Pass B: lift graph representation to nodes + fused GRUCell
# ---------------------------------------------------------------------------
def _gru_kernel(
    ids_ref,      # [TV, 1] int32
    h_ref,        # [TV, D] f32    flattened node embeddings (GRU hidden state)
    grepr_ref,    # [G, Gf] f32    per-graph representation
    wi_ref,       # [Gf, 3D]       fused [W_ir | W_iz | W_in] (pre-transposed)
    wh_ref,       # [D, 3D]        fused [W_hr | W_hz | W_hn] (pre-transposed)
    bi_ref,       # [1, 3D] f32    fused [b_ir | b_iz | b_in]
    bh_ref,       # [1, 3D] f32    fused [b_hr | b_hz | b_hn]
    out_ref,      # [TV, D]
    *,
    num_graphs: int,
    hidden_dim: int,
    mx_dtype,
):
    G, D = num_graphs, hidden_dim
    TV = h_ref.shape[0]

    ids = ids_ref[...]
    # f32 one-hot lift keeps graph_repr exact even in the bf16 MXU path (the
    # 0/1 one-hot is exact, graph_repr stays f32). MXU has ample slack here.
    onehot_f = (lax.broadcasted_iota(jnp.int32, (TV, G), 1) == ids).astype(jnp.float32)
    lifted = jnp.dot(onehot_f, grepr_ref[...],
                     preferred_element_type=jnp.float32)                  # [TV, Gf]

    h = h_ref[...]                                                        # [TV, D] f32
    # Two fused gate matmuls instead of six.
    gi = jnp.dot(lifted.astype(mx_dtype), wi_ref[...].astype(mx_dtype),
                 preferred_element_type=jnp.float32) + bi_ref[...]        # [TV, 3D]
    gh = jnp.dot(h.astype(mx_dtype), wh_ref[...].astype(mx_dtype),
                 preferred_element_type=jnp.float32) + bh_ref[...]        # [TV, 3D]

    r = jax.nn.sigmoid(gi[:, 0:D] + gh[:, 0:D])
    z = jax.nn.sigmoid(gi[:, D:2 * D] + gh[:, D:2 * D])
    n = jnp.tanh(gi[:, 2 * D:3 * D] + r * gh[:, 2 * D:3 * D])
    out_ref[...] = ((1.0 - z) * n + z * h).astype(out_ref.dtype)


# ---------------------------------------------------------------------------
# Wrapper
# ---------------------------------------------------------------------------
def graph_global_gru_exchange(node_embeddings, node_to_graph_map, num_graphs, params,
                              *, tile_v=1024, matmul_dtype=jnp.bfloat16):
    """node_embeddings: [V, Hin, F] f32, node_to_graph_map: [V] int32 -> [V, Hin, F]."""
    V, Hin, F = node_embeddings.shape
    D = Hin * F
    G = int(num_graphs)
    H = params["w_score"].shape[1]
    Gf = params["w_val"].shape[1]
    assert Gf % H == 0, "num_graph_features must be divisible by num_heads"
    f32 = jnp.float32

    # Pad V to a tile multiple; padded rows carry a sentinel graph id (== G) so
    # they contribute nothing to the per-graph softmax / sums.
    num_tiles = int(pl.cdiv(V, tile_v))
    Vp = num_tiles * tile_v
    pad = Vp - V
    h_flat = jnp.pad(node_embeddings.reshape(V, D).astype(f32), ((0, pad), (0, 0)))
    ids_col = jnp.pad(node_to_graph_map.astype(jnp.int32), (0, pad),
                      constant_values=G).reshape(Vp, 1)

    # Fused projection weights: [scoring | transformation].
    w_proj = jnp.concatenate([params["w_score"], params["w_val"]], axis=1).astype(matmul_dtype)
    b_proj = jnp.concatenate([params["b_score"], params["b_val"]]).reshape(1, H + Gf).astype(f32)
    head_exp = jnp.kron(jnp.eye(H, dtype=f32), jnp.ones((1, Gf // H), f32))   # [H, Gf] f32

    # Fused GRU gate weights, PyTorch nn.GRUCell packing order (r | z | n).
    w_i = jnp.concatenate([params["w_ir"], params["w_iz"], params["w_in"]], axis=1).astype(matmul_dtype)
    w_h = jnp.concatenate([params["w_hr"], params["w_hz"], params["w_hn"]], axis=1).astype(matmul_dtype)
    b_i = jnp.concatenate([params["b_ir"], params["b_iz"], params["b_in"]]).reshape(1, 3 * D).astype(f32)
    b_h = jnp.concatenate([params["b_hr"], params["b_hz"], params["b_hn"]]).reshape(1, 3 * D).astype(f32)

    itemsize = jnp.dtype(matmul_dtype).itemsize

    # ---- Pass A: online per-graph softmax-weighted sum (single pass) -----------
    seg_cost = pl.CostEstimate(
        flops=int(2 * Vp * F * (H + Gf) + 2 * Vp * G * (2 * H + Gf) + 2 * Vp * H * Gf),
        transcendentals=int(Vp * H),
        bytes_accessed=int(Vp * D * 4 + Vp * 4
                           + (F * (H + Gf) + H * Gf) * itemsize + G * Gf * 4),
    )
    graph_repr = pl.pallas_call(
        functools.partial(_segment_softmax_kernel, num_heads=H, num_graphs=G,
                          num_in_heads=Hin, mx_dtype=matmul_dtype),
        grid_spec=pltpu.PrefetchScalarGridSpec(
            num_scalar_prefetch=0,
            grid=(num_tiles,),
            in_specs=[
                pl.BlockSpec((tile_v, 1), lambda i: (i, 0)),        # ids
                pl.BlockSpec((tile_v, D), lambda i: (i, 0)),        # h tile
                pl.BlockSpec((F, H + Gf), lambda i: (0, 0)),        # w_proj (resident)
                pl.BlockSpec((1, H + Gf), lambda i: (0, 0)),        # b_proj (resident)
                pl.BlockSpec((H, Gf), lambda i: (0, 0)),            # head_exp (resident)
            ],
            out_specs=pl.BlockSpec((G, Gf), lambda i: (0, 0)),
            scratch_shapes=[
                pltpu.VMEM((H, G), jnp.float32),      # running per-graph score max
                pltpu.VMEM((H, G), jnp.float32),      # running softmax denominators
                pltpu.VMEM((G, Gf), jnp.float32),     # running weighted numerators
            ],
        ),
        out_shape=jax.ShapeDtypeStruct((G, Gf), jnp.float32),
        compiler_params=pltpu.CompilerParams(
            dimension_semantics=("arbitrary",),
            vmem_limit_bytes=_VMEM_LIMIT_BYTES),
        cost_estimate=seg_cost,
    )(ids_col, h_flat, w_proj, b_proj, head_exp)

    # ---- Pass B: lift + GRU cell, tiled over node rows ("parallel") ------------
    gru_cost = pl.CostEstimate(
        flops=int(2 * Vp * (G * Gf + Gf * 3 * D + D * 3 * D)),
        transcendentals=int(3 * Vp * D),
        bytes_accessed=int(Vp * D * 4 + Vp * 4 + (Gf * 3 * D + D * 3 * D) * itemsize
                           + G * Gf * 4 + Vp * D * 4),
    )
    h_new = pl.pallas_call(
        functools.partial(_gru_kernel, num_graphs=G, hidden_dim=D,
                          mx_dtype=matmul_dtype),
        grid=(num_tiles,),
        in_specs=[
            pl.BlockSpec((tile_v, 1), lambda i: (i, 0)),               # ids
            pl.BlockSpec((tile_v, D), lambda i: (i, 0)),               # h tile
            pl.BlockSpec((G, Gf), lambda i: (0, 0)),                   # graph_repr (resident)
            pl.BlockSpec((Gf, 3 * D), lambda i: (0, 0)),               # w_i (resident)
            pl.BlockSpec((D, 3 * D), lambda i: (0, 0)),                # w_h (resident)
            pl.BlockSpec((1, 3 * D), lambda i: (0, 0)),                # b_i
            pl.BlockSpec((1, 3 * D), lambda i: (0, 0)),                # b_h
        ],
        out_specs=pl.BlockSpec((tile_v, D), lambda i: (i, 0)),
        out_shape=jax.ShapeDtypeStruct((Vp, D), jnp.float32),
        scratch_shapes=[],
        compiler_params=pltpu.CompilerParams(
            dimension_semantics=("parallel",),
            vmem_limit_bytes=_VMEM_LIMIT_BYTES),
        cost_estimate=gru_cost,
    )(ids_col, h_flat, graph_repr, w_i, w_h, b_i, b_h)

    return h_new[:V].reshape(V, Hin, F)


# ---------------------------------------------------------------------------
# Pure-JAX reference (segment ops) for validation
# ---------------------------------------------------------------------------
def _reference(node_embeddings, node_to_graph_map, num_graphs, params):
    V, Hin, F = node_embeddings.shape
    D = Hin * F
    H = params["w_score"].shape[1]
    Gf = params["w_val"].shape[1]

    x_mean = node_embeddings.mean(axis=1)
    h = node_embeddings.reshape(V, D)

    scores = x_mean @ params["w_score"] + params["b_score"]
    m = jax.ops.segment_max(scores, node_to_graph_map, num_segments=num_graphs)
    num = jnp.exp(scores - m[node_to_graph_map])
    denom = jax.ops.segment_sum(num, node_to_graph_map, num_segments=num_graphs)
    weights = num / denom[node_to_graph_map]

    values = x_mean @ params["w_val"] + params["b_val"]
    weighted = (weights[:, :, None] * values.reshape(V, H, Gf // H)).reshape(V, Gf)
    graph_repr = jax.ops.segment_sum(weighted, node_to_graph_map, num_segments=num_graphs)
    per_node = graph_repr[node_to_graph_map]

    r = jax.nn.sigmoid(per_node @ params["w_ir"] + params["b_ir"]
                       + h @ params["w_hr"] + params["b_hr"])
    z = jax.nn.sigmoid(per_node @ params["w_iz"] + params["b_iz"]
                       + h @ params["w_hz"] + params["b_hz"])
    n = jnp.tanh(per_node @ params["w_in"] + params["b_in"]
                 + r * (h @ params["w_hn"] + params["b_hn"]))
    return ((1.0 - z) * n + z * h).reshape(V, Hin, F)


def _init_params(key, num_graph_features, num_node_features, num_in_heads, num_heads=4):
    """Deterministic synthetic parameters mirroring the module's __init__ shapes."""
    F = num_node_features // num_in_heads   # in-features of WeightedSumGraphRepresentation
    Gf = num_graph_features
    D = num_node_features
    keys = jax.random.split(key, 16)
    s = 0.1
    nrm = lambda k, shape: s * jax.random.normal(k, shape, jnp.float32)
    return {
        # WeightedSumGraphRepresentation (scoring -> num_heads, transformation -> Gf)
        "w_score": nrm(keys[0], (F, num_heads)), "b_score": nrm(keys[1], (num_heads,)),
        "w_val": nrm(keys[2], (F, Gf)), "b_val": nrm(keys[3], (Gf,)),
        # nn.GRUCell(Gf, D)  (weights stored pre-transposed: [in, out])
        "w_ir": nrm(keys[4], (Gf, D)), "w_iz": nrm(keys[5], (Gf, D)), "w_in": nrm(keys[6], (Gf, D)),
        "w_hr": nrm(keys[7], (D, D)), "w_hz": nrm(keys[8], (D, D)), "w_hn": nrm(keys[9], (D, D)),
        "b_ir": nrm(keys[10], (D,)), "b_iz": nrm(keys[11], (D,)), "b_in": nrm(keys[12], (D,)),
        "b_hr": nrm(keys[13], (D,)), "b_hz": nrm(keys[14], (D,)), "b_hn": nrm(keys[15], (D,)),
    }


if __name__ == "__main__":
    # Small shapes consistent with the module:
    #   V=300 nodes, num_in_heads=2, per-head feature dim F=16 => D=32
    #   num_graph_features Gf=16 (divisible by 4 heads), G=5 graphs.
    V, Hin, F = 300, 2, 16
    Gf, G, H = 16, 5, 4

    key = jax.random.PRNGKey(0)
    k_x, k_m, k_p = jax.random.split(key, 3)
    node_embeddings = jax.random.normal(k_x, (V, Hin, F), jnp.float32)
    node_to_graph_map = jax.random.randint(k_m, (V,), 0, G).astype(jnp.int32)
    params = _init_params(k_p, num_graph_features=Gf, num_node_features=Hin * F,
                          num_in_heads=Hin, num_heads=H)

    ref = _reference(node_embeddings, node_to_graph_map, G, params)

    # f32 matmul path with a small tile (3 node tiles) to exercise the online
    # multi-tile accumulation + sentinel padding; tight tolerance.
    out_f32 = graph_global_gru_exchange(node_embeddings, node_to_graph_map, G, params,
                                        tile_v=128, matmul_dtype=jnp.float32)
    out_f32 = jax.block_until_ready(out_f32)
    assert out_f32.shape == node_embeddings.shape
    err = float(jnp.max(jnp.abs(out_f32 - ref)))
    assert jnp.allclose(out_f32, ref, rtol=2e-5, atol=2e-5), f"f32 max abs err {err}"

    # Production-default path: tile_v=1024, bf16 MXU operands (f32 accumulate).
    out_def = graph_global_gru_exchange(node_embeddings, node_to_graph_map, G, params)
    out_def = jax.block_until_ready(out_def)
    err_bf16 = float(jnp.max(jnp.abs(out_def - ref)))
    assert jnp.allclose(out_def, ref, rtol=5e-2, atol=5e-2), f"bf16 max abs err {err_bf16}"

    print("KERNEL_OK")
</pallas_src>

<mosaic_0001>
module attributes {stable_mosaic.version = 11 : i64} {
  func.func @_segment_softmax_kernel(%arg0: i32, %arg1: memref<128x1xi32, #tpu.memory_space<vmem>>, %arg2: memref<128x32xf32, #tpu.memory_space<vmem>>, %arg3: memref<16x20xf32, #tpu.memory_space<vmem>>, %arg4: memref<1x20xf32, #tpu.memory_space<vmem>>, %arg5: memref<4x16xf32, #tpu.memory_space<vmem>>, %arg6: memref<5x16xf32, #tpu.memory_space<vmem>>, %arg7: memref<4x5xf32, #tpu.memory_space<vmem>>, %arg8: memref<4x5xf32, #tpu.memory_space<vmem>>, %arg9: memref<5x16xf32, #tpu.memory_space<vmem>>) attributes {dimension_semantics = [#tpu.dimension_semantics<arbitrary>], iteration_bounds = array<i64: 3>, scalar_prefetch = 0 : i64, scratch_operands = 3 : i64, tpu.core_type = #tpu.core_type<tc>, window_params = [{transform_indices = @transform_0, window_bounds = array<i64: 128, 1>}, {transform_indices = @transform_1, window_bounds = array<i64: 128, 32>}, {pipeline_mode = #tpu.pipeline_mode<synchronous>, transform_indices = @transform_2, window_bounds = array<i64: 16, 20>}, {pipeline_mode = #tpu.pipeline_mode<synchronous>, transform_indices = @transform_3, window_bounds = array<i64: 1, 20>}, {pipeline_mode = #tpu.pipeline_mode<synchronous>, transform_indices = @transform_4, window_bounds = array<i64: 4, 16>}, {pipeline_mode = #tpu.pipeline_mode<synchronous>, transform_indices = @transform_5, window_bounds = array<i64: 5, 16>}]} {
    %c0_i32 = arith.constant 0 : i32
    %0 = arith.cmpi eq, %arg0, %c0_i32 : i32
    %1 = arith.extui %0 : i1 to i32
    %c0_i32_0 = arith.constant 0 : i32
    %2 = arith.cmpi ne, %1, %c0_i32_0 : i32
    scf.if %2 {
      %cst_43 = arith.constant -1.000000e+30 : f32
      %94 = vector.broadcast %cst_43 : f32 to vector<4x5xf32>
      %c0_44 = arith.constant 0 : index
      %c0_45 = arith.constant 0 : index
      %95 = vector.load %arg7[%c0_44, %c0_45] : memref<4x5xf32, #tpu.memory_space<vmem>>, vector<4x5xf32>
      tpu.vector_store %arg7[%c0_44, %c0_45], %94 {strides = array<i32>} : memref<4x5xf32, #tpu.memory_space<vmem>>, vector<4x5xf32>,
      %cst_46 = arith.constant 0.000000e+00 : f32
      %96 = vector.broadcast %cst_46 : f32 to vector<4x5xf32>
      %c0_47 = arith.constant 0 : index
      %c0_48 = arith.constant 0 : index
      %97 = vector.load %arg8[%c0_47, %c0_48] : memref<4x5xf32, #tpu.memory_space<vmem>>, vector<4x5xf32>
      tpu.vector_store %arg8[%c0_47, %c0_48], %96 {strides = array<i32>} : memref<4x5xf32, #tpu.memory_space<vmem>>, vector<4x5xf32>,
      %cst_49 = arith.constant 0.000000e+00 : f32
      %98 = vector.broadcast %cst_49 : f32 to vector<5x16xf32>
      %c0_50 = arith.constant 0 : index
      %c0_51 = arith.constant 0 : index
      %99 = vector.load %arg9[%c0_50, %c0_51] : memref<5x16xf32, #tpu.memory_space<vmem>>, vector<5x16xf32>
      tpu.vector_store %arg9[%c0_50, %c0_51], %98 {strides = array<i32>} : memref<5x16xf32, #tpu.memory_space<vmem>>, vector<5x16xf32>,
    } else {
    }
    %c0 = arith.constant 0 : index
    %c0_1 = arith.constant 0 : index
    %3 = vector.load %arg1[%c0, %c0_1] : memref<128x1xi32, #tpu.memory_space<vmem>>, vector<128x1xi32>
    %c5_i32 = arith.constant 5 : i32
    %4 = vector.broadcast %c5_i32 : i32 to vector<128x1xi32>
    %5 = arith.cmpi slt, %3, %4 : vector<128x1xi32>
    %6 = tpu.iota {dimensions = array<i32: 1>} : vector<128x5xi32>
    %7 = vector.broadcast %3 : vector<128x1xi32> to vector<128x5xi32>
    %8 = arith.cmpi eq, %6, %7 : vector<128x5xi32>
    %9 = arith.extui %8 : vector<128x5xi1> to vector<128x5xi32>
    %10 = arith.sitofp %9 : vector<128x5xi32> to vector<128x5xf32>
    %11 = arith.extui %8 : vector<128x5xi1> to vector<128x5xi32>
    %12 = arith.sitofp %11 : vector<128x5xi32> to vector<128x5xf32>
    %c0_2 = arith.constant 0 : index
    %c0_3 = arith.constant 0 : index
    %13 = vector.load %arg5[%c0_2, %c0_3] : memref<4x16xf32, #tpu.memory_space<vmem>>, vector<4x16xf32>
    %c0_4 = arith.constant 0 : index
    %c0_5 = arith.constant 0 : index
    %14 = vector.load %arg2[%c0_4, %c0_5] : memref<128x32xf32, #tpu.memory_space<vmem>>, vector<128x32xf32>
    %15 = vector.extract_strided_slice %14 {offsets = [0, 0], sizes = [128, 16], strides = [1, 1]} : vector<128x32xf32> to vector<128x16xf32>
    %16 = vector.extract_strided_slice %14 {offsets = [0, 16], sizes = [128, 16], strides = [1, 1]} : vector<128x32xf32> to vector<128x16xf32>
    %17 = arith.addf %15, %16 : vector<128x16xf32>
    %cst = arith.constant 5.000000e-01 : f32
    %18 = vector.broadcast %cst : f32 to vector<128x16xf32>
    %19 = arith.mulf %17, %18 : vector<128x16xf32>
    %c0_6 = arith.constant 0 : index
    %c0_7 = arith.constant 0 : index
    %20 = vector.load %arg3[%c0_6, %c0_7] : memref<16x20xf32, #tpu.memory_space<vmem>>, vector<16x20xf32>
    %cst_8 = arith.constant dense<0.000000e+00> : vector<128x20xf32>
    %21 = tpu.matmul %19, %20, %cst_8 {dimension_numbers = #tpu.dot_dimension_numbers<[1], [0], [0], [1], [0, 0, 1, 1], [], []>} : vector<128x16xf32>, vector<16x20xf32>, vector<128x20xf32> -> vector<128x20xf32>
    %c0_9 = arith.constant 0 : index
    %c0_10 = arith.constant 0 : index
    %22 = vector.load %arg4[%c0_9, %c0_10] : memref<1x20xf32, #tpu.memory_space<vmem>>, vector<1x20xf32>
    %23 = vector.broadcast %22 : vector<1x20xf32> to vector<128x20xf32>
    %24 = arith.addf %21, %23 : vector<128x20xf32>
    %25 = vector.extract_strided_slice %24 {offsets = [0, 0], sizes = [128, 4], strides = [1, 1]} : vector<128x20xf32> to vector<128x4xf32>
    %26 = vector.extract_strided_slice %24 {offsets = [0, 4], sizes = [128, 16], strides = [1, 1]} : vector<128x20xf32> to vector<128x16xf32>
    %c0_11 = arith.constant 0 : index
    %c0_12 = arith.constant 0 : index
    %27 = vector.load %arg7[%c0_11, %c0_12] : memref<4x5xf32, #tpu.memory_space<vmem>>, vector<4x5xf32>
    %28 = vector.extract_strided_slice %25 {offsets = [0, 0], sizes = [128, 1], strides = [1, 1]} : vector<128x4xf32> to vector<128x1xf32>
    %cst_13 = arith.constant -1.000000e+30 : f32
    %29 = vector.shape_cast %28 : vector<128x1xf32> to vector<128x1xf32>
    %30 = vector.broadcast %29 : vector<128x1xf32> to vector<128x5xf32>
    %31 = vector.broadcast %cst_13 : f32 to vector<128x5xf32>
    %32 = arith.select %8, %30, %31 : vector<128x5xi1>, vector<128x5xf32>
    %33 = vector.extract_strided_slice %27 {offsets = [0, 0], sizes = [1, 5], strides = [1, 1]} : vector<4x5xf32> to vector<1x5xf32>
    %cst_14 = arith.constant dense<0xFF800000> : vector<5xf32>
    %34 = vector.multi_reduction <maximumf>, %32, %cst_14 [0] : vector<128x5xf32> to vector<5xf32>
    %35 = vector.shape_cast %34 : vector<5xf32> to vector<1x5xf32>
    %36 = arith.maximumf %33, %35 : vector<1x5xf32>
    %c0_15 = arith.constant 0 : index
    %c0_16 = arith.constant 0 : index
    %37 = vector.load %arg7[%c0_15, %c0_16] : memref<4x5xf32, #tpu.memory_space<vmem>>, vector<1x5xf32>
    tpu.vector_store %arg7[%c0_15, %c0_16], %36 {strides = array<i32>} : memref<4x5xf32, #tpu.memory_space<vmem>>, vector<1x5xf32>,
    %38 = vector.extract_strided_slice %25 {offsets = [0, 1], sizes = [128, 1], strides = [1, 1]} : vector<128x4xf32> to vector<128x1xf32>
    %cst_17 = arith.constant -1.000000e+30 : f32
    %39 = vector.shape_cast %38 : vector<128x1xf32> to vector<128x1xf32>
    %40 = vector.broadcast %39 : vector<128x1xf32> to vector<128x5xf32>
    %41 = vector.broadcast %cst_17 : f32 to vector<128x5xf32>
    %42 = arith.select %8, %40, %41 : vector<128x5xi1>, vector<128x5xf32>
    %43 = vector.extract_strided_slice %27 {offsets = [1, 0], sizes = [1, 5], strides = [1, 1]} : vector<4x5xf32> to vector<1x5xf32>
    %cst_18 = arith.constant dense<0xFF800000> : vector<5xf32>
    %44 = vector.multi_reduction <maximumf>, %42, %cst_18 [0] : vector<128x5xf32> to vector<5xf32>
    %45 = vector.shape_cast %44 : vector<5xf32> to vector<1x5xf32>
    %46 = arith.maximumf %43, %45 : vector<1x5xf32>
    %c1 = arith.constant 1 : index
    %c0_19 = arith.constant 0 : index
    %47 = vector.load %arg7[%c1, %c0_19] : memref<4x5xf32, #tpu.memory_space<vmem>>, vector<1x5xf32>
    tpu.vector_store %arg7[%c1, %c0_19], %46 {strides = array<i32>} : memref<4x5xf32, #tpu.memory_space<vmem>>, vector<1x5xf32>,
    %48 = vector.extract_strided_slice %25 {offsets = [0, 2], sizes = [128, 1], strides = [1, 1]} : vector<128x4xf32> to vector<128x1xf32>
    %cst_20 = arith.constant -1.000000e+30 : f32
    %49 = vector.shape_cast %48 : vector<128x1xf32> to vector<128x1xf32>
    %50 = vector.broadcast %49 : vector<128x1xf32> to vector<128x5xf32>
    %51 = vector.broadcast %cst_20 : f32 to vector<128x5xf32>
    %52 = arith.select %8, %50, %51 : vector<128x5xi1>, vector<128x5xf32>
    %53 = vector.extract_strided_slice %27 {offsets = [2, 0], sizes = [1, 5], strides = [1, 1]} : vector<4x5xf32> to vector<1x5xf32>
    %cst_21 = arith.constant dense<0xFF800000> : vector<5xf32>
    %54 = vector.multi_reduction <maximumf>, %52, %cst_21 [0] : vector<128x5xf32> to vector<5xf32>
    %55 = vector.shape_cast %54 : vector<5xf32> to vector<1x5xf32>
    %56 = arith.maximumf %53, %55 : vector<1x5xf32>
    %c2 = arith.constant 2 : index
    %c0_22 = arith.constant 0 : index
    %57 = vector.load %arg7[%c2, %c0_22] : memref<4x5xf32, #tpu.memory_space<vmem>>, vector<1x5xf32>
    tpu.vector_store %arg7[%c2, %c0_22], %56 {strides = array<i32>} : memref<4x5xf32, #tpu.memory_space<vmem>>, vector<1x5xf32>,
    %58 = vector.extract_strided_slice %25 {offsets = [0, 3], sizes = [128, 1], strides = [1, 1]} : vector<128x4xf32> to vector<128x1xf32>
    %cst_23 = arith.constant -1.000000e+30 : f32
    %59 = vector.shape_cast %58 : vector<128x1xf32> to vector<128x1xf32>
    %60 = vector.broadcast %59 : vector<128x1xf32> to vector<128x5xf32>
    %61 = vector.broadcast %cst_23 : f32 to vector<128x5xf32>
    %62 = arith.select %8, %60, %61 : vector<128x5xi1>, vector<128x5xf32>
    %63 = vector.extract_strided_slice %27 {offsets = [3, 0], sizes = [1, 5], strides = [1, 1]} : vector<4x5xf32> to vector<1x5xf32>
    %cst_24 = arith.constant dense<0xFF800000> : vector<5xf32>
    %64 = vector.multi_reduction <maximumf>, %62, %cst_24 [0] : vector<128x5xf32> to vector<5xf32>
    %65 = vector.shape_cast %64 : vector<5xf32> to vector<1x5xf32>
    %66 = arith.maximumf %63, %65 : vector<1x5xf32>
    %c3 = arith.constant 3 : index
    %c0_25 = arith.constant 0 : index
    %67 = vector.load %arg7[%c3, %c0_25] : memref<4x5xf32, #tpu.memory_space<vmem>>, vector<1x5xf32>
    tpu.vector_store %arg7[%c3, %c0_25], %66 {strides = array<i32>} : memref<4x5xf32, #tpu.memory_space<vmem>>, vector<1x5xf32>,
    %c0_26 = arith.constant 0 : index
    %c0_27 = arith.constant 0 : index
    %68 = vector.load %arg7[%c0_26, %c0_27] : memref<4x5xf32, #tpu.memory_space<vmem>>, vector<4x5xf32>
    %69 = arith.subf %27, %68 : vector<4x5xf32>
    %70 = math.exp %69 : vector<4x5xf32>
    "tpu.trace_start"() <{level = 10 : i32, message = "vg,hg->vh"}> : () -> ()
    %cst_28 = arith.constant dense<0.000000e+00> : vector<128x4xf32>
    %71 = tpu.matmul %10, %68, %cst_28 {dimension_numbers = #tpu.dot_dimension_numbers<[1], [1], [0], [0], [0, 0, 1, 0], [], []>} : vector<128x5xf32>, vector<4x5xf32>, vector<128x4xf32> -> vector<128x4xf32>
    "tpu.trace_stop"() : () -> ()
    %72 = arith.subf %25, %71 : vector<128x4xf32>
    %cst_29 = arith.constant -1.000000e+30 : f32
    %73 = vector.shape_cast %5 : vector<128x1xi1> to vector<128x1xi1>
    %74 = vector.broadcast %73 : vector<128x1xi1> to vector<128x4xi1>
    %75 = vector.broadcast %cst_29 : f32 to vector<128x4xf32>
    %76 = arith.select %74, %72, %75 : vector<128x4xi1>, vector<128x4xf32>
    %77 = math.exp %76 : vector<128x4xf32>
    %c0_30 = arith.constant 0 : index
    %c0_31 = arith.constant 0 : index
    %78 = vector.load %arg8[%c0_30, %c0_31] : memref<4x5xf32, #tpu.memory_space<vmem>>, vector<4x5xf32>
    %79 = arith.mulf %70, %78 : vector<4x5xf32>
    "tpu.trace_start"() <{level = 10 : i32, message = "vh,vg->hg"}> : () -> ()
    %cst_32 = arith.constant dense<0.000000e+00> : vector<4x5xf32>
    %80 = tpu.matmul %77, %12, %cst_32 {dimension_numbers = #tpu.dot_dimension_numbers<[0], [0], [1], [1], [0, 1, 1, 1], [], []>} : vector<128x4xf32>, vector<128x5xf32>, vector<4x5xf32> -> vector<4x5xf32>
    "tpu.trace_stop"() : () -> ()
    %81 = arith.addf %79, %80 : vector<4x5xf32>
    %c0_33 = arith.constant 0 : index
    %c0_34 = arith.constant 0 : index
    %82 = vector.load %arg8[%c0_33, %c0_34] : memref<4x5xf32, #tpu.memory_space<vmem>>, vector<4x5xf32>
    tpu.vector_store %arg8[%c0_33, %c0_34], %81 {strides = array<i32>} : memref<4x5xf32, #tpu.memory_space<vmem>>, vector<4x5xf32>,
    %cst_35 = arith.constant dense<0.000000e+00> : vector<128x16xf32>
    %83 = tpu.matmul %77, %13, %cst_35 {dimension_numbers = #tpu.dot_dimension_numbers<[1], [0], [0], [1], [0, 0, 1, 1], [], []>} : vector<128x4xf32>, vector<4x16xf32>, vector<128x16xf32> -> vector<128x16xf32>
    %84 = arith.mulf %83, %26 : vector<128x16xf32>
    "tpu.trace_start"() <{level = 10 : i32, message = "hg,hf->gf"}> : () -> ()
    %cst_36 = arith.constant dense<0.000000e+00> : vector<5x16xf32>
    %85 = tpu.matmul %70, %13, %cst_36 {dimension_numbers = #tpu.dot_dimension_numbers<[0], [0], [1], [1], [0, 1, 1, 1], [], []>} : vector<4x5xf32>, vector<4x16xf32>, vector<5x16xf32> -> vector<5x16xf32>
    "tpu.trace_stop"() : () -> ()
    %c0_37 = arith.constant 0 : index
    %c0_38 = arith.constant 0 : index
    %86 = vector.load %arg9[%c0_37, %c0_38] : memref<5x16xf32, #tpu.memory_space<vmem>>, vector<5x16xf32>
    %87 = arith.mulf %85, %86 : vector<5x16xf32>
    "tpu.trace_start"() <{level = 10 : i32, message = "vg,vf->gf"}> : () -> ()
    %cst_39 = arith.constant dense<0.000000e+00> : vector<5x16xf32>
    %88 = tpu.matmul %12, %84, %cst_39 {dimension_numbers = #tpu.dot_dimension_numbers<[0], [0], [1], [1], [0, 1, 1, 1], [], []>} : vector<128x5xf32>, vector<128x16xf32>, vector<5x16xf32> -> vector<5x16xf32>
    "tpu.trace_stop"() : () -> ()
    %89 = arith.addf %87, %88 : vector<5x16xf32>
    %c0_40 = arith.constant 0 : index
    %c0_41 = arith.constant 0 : index
    %90 = vector.load %arg9[%c0_40, %c0_41] : memref<5x16xf32, #tpu.memory_space<vmem>>, vector<5x16xf32>
    tpu.vector_store %arg9[%c0_40, %c0_41], %89 {strides = array<i32>} : memref<5x16xf32, #tpu.memory_space<vmem>>, vector<5x16xf32>,
    %c2_i32 = arith.constant 2 : i32
    %91 = arith.cmpi eq, %arg0, %c2_i32 : i32
    %92 = arith.extui %91 : i1 to i32
    %c0_i32_42 = arith.constant 0 : i32
    %93 = arith.cmpi ne, %92, %c0_i32_42 : i32
    scf.if %93 {
      %c0_43 = arith.constant 0 : index
      %c0_44 = arith.constant 0 : index
      %94 = vector.load %arg8[%c0_43, %c0_44] : memref<4x5xf32, #tpu.memory_space<vmem>>, vector<4x5xf32>
      "tpu.trace_start"() <{level = 10 : i32, message = "hg,hf->gf"}> : () -> ()
      %cst_45 = arith.constant dense<0.000000e+00> : vector<5x16xf32>
      %95 = tpu.matmul %94, %13, %cst_45 {dimension_numbers = #tpu.dot_dimension_numbers<[0], [0], [1], [1], [0, 1, 1, 1], [], []>} : vector<4x5xf32>, vector<4x16xf32>, vector<5x16xf32> -> vector<5x16xf32>
      "tpu.trace_stop"() : () -> ()
      %c0_46 = arith.constant 0 : index
      %c0_47 = arith.constant 0 : index
      %96 = vector.load %arg9[%c0_46, %c0_47] : memref<5x16xf32, #tpu.memory_space<vmem>>, vector<5x16xf32>
      %cst_48 = arith.constant 1.000000e-30 : f32
      %97 = vector.broadcast %cst_48 : f32 to vector<5x16xf32>
      %98 = arith.maximumf %95, %97 : vector<5x16xf32>
      %99 = arith.divf %96, %98 : vector<5x16xf32>
      %c0_49 = arith.constant 0 : index
      %c0_50 = arith.constant 0 : index
      %100 = vector.load %arg6[%c0_49, %c0_50] : memref<5x16xf32, #tpu.memory_space<vmem>>, vector<5x16xf32>
      tpu.vector_store %arg6[%c0_49, %c0_50], %99 {strides = array<i32>} : memref<5x16xf32, #tpu.memory_space<vmem>>, vector<5x16xf32>,
    } else {
    }
    return
  }
  func.func @transform_0(%arg0: i32) -> (i32, i32) {
    %c0_i32 = arith.constant 0 : i32
    %c0_i32_0 = arith.constant 0 : i32
    return %arg0, %c0_i32 : i32, i32
  }
  func.func @transform_1(%arg0: i32) -> (i32, i32) {
    %c0_i32 = arith.constant 0 : i32
    %c0_i32_0 = arith.constant 0 : i32
    return %arg0, %c0_i32 : i32, i32
  }
  func.func @transform_2(%arg0: i32) -> (i32, i32) {
    %c0_i32 = arith.constant 0 : i32
    %c0_i32_0 = arith.constant 0 : i32
    %c0_i32_1 = arith.constant 0 : i32
    return %c0_i32, %c0_i32_0 : i32, i32
  }
  func.func @transform_3(%arg0: i32) -> (i32, i32) {
    %c0_i32 = arith.constant 0 : i32
    %c0_i32_0 = arith.constant 0 : i32
    %c0_i32_1 = arith.constant 0 : i32
    return %c0_i32, %c0_i32_0 : i32, i32
  }
  func.func @transform_4(%arg0: i32) -> (i32, i32) {
    %c0_i32 = arith.constant 0 : i32
    %c0_i32_0 = arith.constant 0 : i32
    %c0_i32_1 = arith.constant 0 : i32
    return %c0_i32, %c0_i32_0 : i32, i32
  }
  func.func @transform_5(%arg0: i32) -> (i32, i32) {
    %c0_i32 = arith.constant 0 : i32
    %c0_i32_0 = arith.constant 0 : i32
    %c0_i32_1 = arith.constant 0 : i32
    return %c0_i32, %c0_i32_0 : i32, i32
  }
}

</mosaic_0001>

<bundles_post_ra>
// kernel: tpu_custom_call.1
= control target key start
LH: loop header
LB: loop body
LE: loop exit
PB: predicated region body
PF: predicated region fallthrough
CT: control target
= control target key end

     0   :  { %10 = vsyncpa [#allocation6], 0  ;;  %s2210_s18 = smov 0   ;;  %s3250_s0 = inlined_call_operand.vmem [shape: s32[384,1], index: 0, kind: input, shape index: {}]   ;;  %s3251_s1 = inlined_call_operand.vmem [shape: f32[384,32], index: 1, kind: input, shape index: {}]   ;;  %s3252_s2 = inlined_call_operand.vmem [shape: f32[16,20], index: 2, kind: input, shape index: {}]   ;;  %s3253_s3 = inlined_call_operand.vmem [shape: f32[1,20], index: 3, kind: input, shape index: {}]   ;;  %s3254_s4 = inlined_call_operand.vmem [shape: f32[4,16], index: 4, kind: input, shape index: {}]   ;;  %s3255_s5 = inlined_call_operand.hbm [shape: f32[5,16], index: 5, kind: output, shape index: {}]  }
   0x1 LB: > { %s2216_s19 = sadd.s32 4294967295, %s2166_s18   ;;  %p1861_p0 = scmp.ge.s32.totalorder %s2166_s18, 1  ;;  %s2166_s18 = sphi %s2210_s18, %s16_s18  }
   0x2   : > { %p195_p1 = scmp.lt.s32.totalorder %s2166_s18, 4 }
   0x4   : > { %p196_p2 = pnand %p1861_p0, %p195_p1 }
   0x6   : > { %199 = sbr.rel (%p196_p2) target bundleno = 1509 (0x5e5), region = 40 }
   0xb   : > { %s1862_s20 = sshll.u32 %s2216_s19, 4  ;;  %p1866_p4 = scmp.ne.s32.totalorder %s2216_s19, 0 }
   0xc   : > { %p224_p3 = scmp.lt.s32.totalorder %s1862_s20, 47 }
   0xd   : > { %238 = sbr.rel (%p1866_p4) target bundleno = 22 (0x16), region = 44 }
   0xe   : > { %s3374_s20 = smov (!%p224_p3, %s1862_s20), 47 }
   0xf   : > { %s1863_s21 = sshll.u32 %s3374_s20, 3 }
  0x10   : > { %s2224_s24 = scalar_lea.vmem %s3250_s0, %s1863_s21  ;;  %s2229_s27 = scalar_lea.vmem %s3251_s1, %s1863_s21 }
  0x12   : > { %vm239_vm0 = vcmask 35840   ;;  %vm242_vm1 = vcmask 126976   ;;  %v2168_v0 = vmov -1e+30   ;;  %v2169_v1 = vmov 0.0  }
  0x13   : > { %240 = vst.msk [vmem:[#allocation2] sm:$0xf] %vm239_vm0, %v2168_v0 }
  0x14   : > { %241 = vst.msk [vmem:[#allocation3] sm:$0xf] %vm239_vm0, %v2169_v1 }
  0x15   : > { %243 = vst.msk [vmem:[#allocation4] sm:$0x1f] %vm242_vm1, %v2169_v1 }
  0x16 PF: > { %v375_v2 = vld [vmem:[%s2229_s27] sm:$0xff]  ;;  %v377_v3 = vld [vmem:[%s2229_s27 + $0x10] sm:$0xff]  ;;  %s2170_s28 = smov 112   ;;  %v376_v5 = vld [vmem:[%s2229_s27 + $0x8] sm:$0xff]  ;;  %v3260_v20 = vmov 0   ;;  %vm493_vm2 = vcmask 130048  }
  0x17   : > { %407 = vrot.lane.b32.xlu0 %v375_v2, %s2170_s28  ;;  %411 = vrot.lane.b32.xlu1 %v377_v3, %s2170_s28  ;;  %v2237_v4 = vld [vmem:[%s2229_s27 + $0x20] sm:$0xff]  ;;  %v378_v6 = vld [vmem:[%s2229_s27 + $0x18] sm:$0xff]  ;;  %s2176_s10 = smov 124   ;;  %p1951_p5 = scmp.ne.s32.totalorder %s2216_s19, 2 }
  0x18   : > { %415 = vrot.lane.b32.xlu2 %v2237_v4, %s2170_s28  ;;  %v2244_v7 = vld [vmem:[%s2229_s27 + $0x28] sm:$0xff]  ;;  %v2251_v8 = vld [vmem:[%s2229_s27 + $0x30] sm:$0xff]  ;;  %v2254_v9 = vld [vmem:[%s2229_s27 + $0x38] sm:$0xff]  ;;  %2024 = vset.pattern.permute.xlu1 %v3260_v20 }
  0x19   : > { %v2257_v10 = vld [vmem:[%s2229_s27 + $0x40] sm:$0xff]  ;;  %v2266_v11 = vld [vmem:[%s2229_s27 + $0x48] sm:$0xff]  ;;  %v2269_v12 = vld [vmem:[%s2229_s27 + $0x50] sm:$0xff]  ;;  %2026 = vset.pattern.permute.xlu0 %v3260_v20  ;;  %2025 = vset.pattern.permute.xlu2 %v3260_v20 }
  0x1a   : > { %v2276_v13 = vld [vmem:[%s2229_s27 + $0x60] sm:$0xff]  ;;  %v488_v14 = vld [vmem:[%s3252_s2 + $0x8] sm:$0xff]  ;;  %v2292_v17 = vld [vmem:[%s2229_s27 + $0x58] sm:$0xff] }
  0x1b   : > { %556 = vmatpush.msra.mxu0 %v488_v14  ;;  %v487_v15 = vld [vmem:[%s3252_s2] sm:$0xff]  ;;  %v2287_v16 = vld [vmem:[%s2229_s27 + $0x68] sm:$0xff]  ;;  %v2297_v18 = vld [vmem:[%s2229_s27 + $0x78] sm:$0xff] }
  0x1c   : > { %v2300_v19 = vld [vmem:[%s2224_s24] sm:$0xff]  ;;  %v2309_v21 = vld [vmem:[%s2224_s24 + $0x18] sm:$0xff]  ;;  %v2314_v25 = vld [vmem:[%s2229_s27 + $0x70] sm:$0xff] }
  0x1d   : > { %557 = vmatpush.msra.mxu0 %v487_v15  ;;  %v2317_v26 = vld [vmem:[%s2224_s24 + $0x28] sm:$0xff]  ;;  %v2320_v27 = vld [vmem:[%s2224_s24 + $0x10] sm:$0xff]  ;;  %v2331_v34 = vld [vmem:[%s2224_s24 + $0x40] sm:$0xff] }
  0x1e   : > { %v2328_v33 = vld [vmem:[%s2224_s24 + $0x8] sm:$0xff]  ;;  %v2334_v35 = vld [vmem:[%s2224_s24 + $0x38] sm:$0xff]  ;;  %v2341_v39 = vld [vmem:[%s2224_s24 + $0x20] sm:$0xff] }
  0x1f   : > { %409 = vrot.lane.b32.xlu0 %v376_v5, %s2170_s28  ;;  %413 = vrot.lane.b32.xlu1 %v378_v6, %s2170_s28  ;;  %v2344_v40 = vld [vmem:[%s2224_s24 + $0x58] sm:$0xff]  ;;  %v2347_v41 = vld [vmem:[%s2224_s24 + $0x50] sm:$0xff] }
  0x20   : > { %417 = vrot.lane.b32.xlu2 %v2244_v7, %s2170_s28  ;;  %v2353_v44 = vld [vmem:[%s2224_s24 + $0x30] sm:$0xff]  ;;  %v2356_v45 = vld [vmem:[%s2224_s24 + $0x68] sm:$0xff]  ;;  %v2373_v54 = vld [vmem:[%s2224_s24 + $0x60] sm:$0xff] }
  0x21   : > { %v2359_v46 = vld [vmem:[%s2224_s24 + $0x70] sm:$0xff]  ;;  %v2367_v50 = vld [vmem:[%s2224_s24 + $0x48] sm:$0xff]  ;;  %v2379_v58 = vld [vmem:[%s2224_s24 + $0x78] sm:$0xff] }
  0x27   : > { %419 = vrot.lane.b32.xlu0 %v2251_v8, %s2170_s28  ;;  %421 = vrot.lane.b32.xlu1 %v2254_v9, %s2170_s28 }
  0x28   : > { %423 = vrot.lane.b32.xlu2 %v2257_v10, %s2170_s28 }
  0x2f   : > { %425 = vrot.lane.b32.xlu0 %v2266_v11, %s2170_s28  ;;  %427 = vrot.lane.b32.xlu1 %v2269_v12, %s2170_s28 }
  0x30   : > { %429 = vrot.lane.b32.xlu2 %v2292_v17, %s2170_s28 }
  0x37   : > { %431 = vrot.lane.b32.xlu0 %v2276_v13, %s2170_s28  ;;  %433 = vrot.lane.b32.xlu1 %v2287_v16, %s2170_s28 }
  0x38   : > { %435 = vrot.lane.b32.xlu2 %v2314_v25, %s2170_s28 }
  0x3f   : > { %437 = vrot.lane.b32.xlu0 %v2297_v18, %s2170_s28  ;;  %279 = vperm.xlu1 %2024, %v2300_v19  }
  0x40   : > { %282 = vperm.xlu2 %2025, %v2328_v33  }
  0x47   : > { %288 = vperm.xlu1 %2024, %v2309_v21   ;;  %285 = vperm.xlu0 %2026, %v2320_v27  }
  0x48   : > { %291 = vperm.xlu2 %2025, %v2341_v39  }
  0x4f   : > { %294 = vperm.xlu1 %2024, %v2317_v26   ;;  %300 = vperm.xlu0 %2026, %v2334_v35  }
  0x50   : > { %297 = vperm.xlu2 %2025, %v2353_v44  }
  0x57   : > { %303 = vperm.xlu1 %2024, %v2331_v34   ;;  %309 = vperm.xlu0 %2026, %v2347_v41  }
  0x58   : > { %306 = vperm.xlu2 %2025, %v2367_v50  }
  0x5f   : > { %312 = vperm.xlu1 %2024, %v2344_v40   ;;  %318 = vperm.xlu0 %2026, %v2356_v45  }
  0x60   : > { %315 = vperm.xlu2 %2025, %v2373_v54  }
  0x67   : > { %321 = vperm.xlu1 %2024, %v2359_v46  }
  0x68   : > { %324 = vperm.xlu2 %2025, %v2379_v58  }
  0x72   : > { %v416_v42 = vpop.permute.xlu2 %415 }
  0x73   : > { %v459_v47 = vadd.f32 %v416_v42, %v2237_v4 }
  0x75   : > { %v475_v48 = vmul.f32 0.5, %v459_v47 }
  0x7a   : > { %v418_v49 = vpop.permute.xlu2 %417 }
  0x7b   : > { %v460_v51 = vadd.f32 %v418_v49, %v2244_v7 }
  0x7d   : > { %v476_v52 = vmul.f32 0.5, %v460_v51 }
  0x82   : > { %v424_v61 = vpop.permute.xlu2 %423 }
  0x83   : > { %v463_v62 = vadd.f32 %v424_v61, %v2257_v10 }
  0x85   : > { %v479_v63 = vmul.f32 0.5, %v463_v62 }
  0x89   : > { %v408_v22 = vpop.permute.xlu0 %407  ;;  %v412_v29 = vpop.permute.xlu1 %411 }
  0x8a   : > { %v455_v23 = vadd.f32 %v408_v22, %v375_v2  ;;  %v457_v32 = vadd.f32 %v412_v29, %v377_v3  ;;  %v3258_v22 = vmov 1  }
  0x8b   : > { %2027 = vset.pattern.permute.xlu2 %v3258_v22 }
  0x8c   : > { %v471_v24 = vmul.f32 0.5, %v455_v23  ;;  %v473_v36 = vmul.f32 0.5, %v457_v32 }
  0x8e   : > { %1883 = vmatmul.msk.f32.vlgmr.msra.gmra.mxu0 %vm493_vm2, %v471_v24 }
  0x91   : > { %v410_v28 = vpop.permute.xlu0 %409  ;;  %v414_v37 = vpop.permute.xlu1 %413 }
  0x92   : > { %v456_v30 = vadd.f32 %v410_v28, %v376_v5  ;;  %v458_v38 = vadd.f32 %v414_v37, %v378_v6  ;;  %v430_v6 = vpop.permute.xlu2 %429 }
  0x93   : > { %v466_v7 = vadd.f32 %v430_v6, %v2292_v17 }
  0x94   : > { %v472_v31 = vmul.f32 0.5, %v456_v30  ;;  %v474_v43 = vmul.f32 0.5, %v458_v38 }
  0x96   : > { %1884 = vmatmul.msk.f32.gmra.mxu0 %vm493_vm2, %v472_v31 }
  0x99   : > { %v420_v53 = vpop.permute.xlu0 %419  ;;  %v422_v57 = vpop.permute.xlu1 %421 }
  0x9a   : > { %v461_v55 = vadd.f32 %v420_v53, %v2251_v8  ;;  %v462_v59 = vadd.f32 %v422_v57, %v2254_v9  ;;  %v482_v8 = vmul.f32 0.5, %v466_v7  ;;  %v436_v14 = vpop.permute.xlu2 %435  ;;  %v3264_v57 = vmov 2  }
  0x9b   : > { %v469_v28 = vadd.f32 %v436_v14, %v2314_v25  ;;  %v2419_v25 = vld [vmem:[%s3253_s3] ss:$0 sm:$0xff] }
  0x9c   : > { %v477_v56 = vmul.f32 0.5, %v461_v55  ;;  %v478_v60 = vmul.f32 0.5, %v462_v59 }
  0x9d   : > { %v485_v29 = vmul.f32 0.5, %v469_v28  ;;  %v3301_v28 = vmov 0 }
  0x9e   : > { %1885 = vmatmul.msk.f32.gmra.mxu0 %vm493_vm2, %v473_v36 }
  0xa1   : > { %v426_v0 = vpop.permute.xlu0 %425  ;;  %v428_v3 = vpop.permute.xlu1 %427 }
  0xa2   : > { %v464_v1 = vadd.f32 %v426_v0, %v2266_v11  ;;  %v465_v4 = vadd.f32 %v428_v3, %v2269_v12  ;;  %v2397_v23 = vpop.permute.xlu2 %282  ;;  %v2174_v0 = vmov 1.0   ;;  %v3284_v3 = vmov 0 }
  0xa4   : > { %v480_v2 = vmul.f32 0.5, %v464_v1  ;;  %v481_v5 = vmul.f32 0.5, %v465_v4  ;;  %v3262_v4 = vmov 3  }
  0xa6   : > { %1886 = vmatmul.msk.f32.gmra.mxu0 %vm493_vm2, %v474_v43 }
  0xa9   : > { %v432_v9 = vpop.permute.xlu0 %431  ;;  %v434_v15 = vpop.permute.xlu1 %433 }
  0xaa   : > { %v467_v10 = vadd.f32 %v432_v9, %v2276_v13  ;;  %v468_v12 = vadd.f32 %v434_v15, %v2287_v16  ;;  %v2403_v13 = vpop.permute.xlu2 %291  ;;  %v3188_v9 = vld [vmem:[%s3254_s4] sm:$0xf] }
  0xac   : > { %v483_v11 = vmul.f32 0.5, %v467_v10  ;;  %v484_v24 = vmul.f32 0.5, %v468_v12  ;;  %v3299_v12 = vmov 0 }
  0xae   : > { %1887 = vmatmul.msk.f32.gmra.mxu0 %vm493_vm2, %v475_v48 }
  0xb1   : > { %v2399_v17 = vpop.permute.xlu1 %279  ;;  %v438_v30 = vpop.permute.xlu0 %437 }
  0xb2   : > { %v470_v32 = vadd.f32 %v438_v30, %v2297_v18  ;;  %v2409_v16 = vpop.permute.xlu2 %297 }
  0xb4   : > { %v486_v36 = vmul.f32 0.5, %v470_v32 }
  0xb6   : > { %1888 = vmatmul.msk.f32.gmra.mxu0 %vm493_vm2, %v476_v52  ;;  %v276_v52 = vlaneseq }
  0xb8   : > { %v2433_v59 = vand.u32 127, %v276_v52 }
  0xb9   : > { %v2405_v31 = vpop.permute.xlu1 %288  ;;  %v2413_v38 = vpop.permute.xlu0 %285 }
  0xba   : > { %v307_v43 = vpop.permute.xlu2 %306  ;;  %vm2553_vm12 = vcmp.eq.s32.totalorder %v2433_v59, %v2409_v16  ;;  %vm2576_vm14 = vcmp.eq.s32.totalorder %v2433_v59, %v2403_v13  ;;  %vm2594_vm15 = vcmp.eq.s32.totalorder %v2433_v59, %v2405_v31  ;;  %vm2609_vm0 = vcmp.eq.s32.totalorder %v2433_v59, %v2413_v38 }
  0xbb   : > { %vm2509_vm9 = vcmp.eq.s32.totalorder %v2433_v59, %v307_v43  ;;  %v3302_v28 = vsel %vm2553_vm12, 4294967295, %v3301_v28  ;;  %vm2623_vm1 = vcmp.eq.s32.totalorder %v2433_v59, %v2397_v23  ;;  %v3314_v38 = vmov 0 }
  0xbe   : > { %1889 = vmatmul.msk.f32.gmra.mxu0 %vm493_vm2, %v477_v56 }
  0xc1   : > { %v2411_v37 = vpop.permute.xlu1 %294  ;;  %v301_v48 = vpop.permute.xlu0 %300 }
  0xc2   : > { %v316_v51 = vpop.permute.xlu2 %315  ;;  %vm2543_vm11 = vcmp.eq.s32.totalorder %v2433_v59, %v301_v48  ;;  %vm2564_vm13 = vcmp.eq.s32.totalorder %v2433_v59, %v2411_v37 }
  0xc3   : > { %vm2470_vm6 = vcmp.eq.s32.totalorder %v2433_v59, %v316_v51  ;;  %v3300_v12 = vsel %vm2543_vm11, 4294967295, %v3299_v12 }
  0xc6   : > { %1890 = vmatmul.msk.f32.gmra.mxu0 %vm493_vm2, %v478_v60 }
  0xc9   : > { %v304_v18 = vpop.permute.xlu1 %303  ;;  %v310_v56 = vpop.permute.xlu0 %309 }
  0xca   : > { %v325_v61 = vpop.permute.xlu2 %324  ;;  %vm2501_vm8 = vcmp.eq.s32.totalorder %v2433_v59, %v310_v56  ;;  %vm2520_vm10 = vcmp.eq.s32.totalorder %v2433_v59, %v304_v18 }
  0xcb   : > { %vm2440_vm3 = vcmp.eq.s32.totalorder %v2433_v59, %v325_v61 }
  0xcc   : > { %1916 = vmatpush.msk.msra.mxu2 %vm2440_vm3, %v2174_v0 }
  0xce   : > { %1891 = vmatmul.msk.f32.gmra.mxu0 %vm493_vm2, %v479_v63  ;;  %v3281_v63 = vmov 0  ;;  %1982 = vmatpush.lsf.msk.msk.msrb.mxu2 %vm2440_vm3, %v2174_v0 }
  0xcf   : > { %v3282_v63 = vsel %vm2440_vm3, 4294967295, %v3281_v63  ;;  %vm264_vm3 = vcmp.lt.s32.totalorder %v2341_v39, 5 }
  0xd0   : > { %3283 = vst [vmem:[#allocation8_spill] sm:$0xff] %v3282_v63 }
  0xd1   : > { %v313_v55 = vpop.permute.xlu1 %312 }
  0xd2   : > { %vm2481_vm7 = vcmp.eq.s32.totalorder %v2433_v59, %v313_v55 }
  0xd6   : > { %1892 = vmatmul.msk.f32.gmra.mxu0 %vm493_vm2, %v480_v2  ;;  %v319_v2 = vpop.permute.xlu0 %318 }
  0xd7   : > { %vm2462_vm5 = vcmp.eq.s32.totalorder %v2433_v59, %v319_v2 }
  0xd9   : > { %v322_v1 = vpop.permute.xlu1 %321 }
  0xda   : > { %vm2453_vm4 = vcmp.eq.s32.totalorder %v2433_v59, %v322_v1 }
  0xdb   : > { %v3285_v3 = vsel %vm2453_vm4, 4294967295, %v3284_v3  ;;  %1917 = vmatpush.msk.msra.mxu2 %vm2453_vm4, %v2174_v0 }
  0xdc   : > { %3286 = vst [vmem:[#allocation9_spill] sm:$0xff] %v3285_v3 }
  0xdd   : > { %1983 = vmatpush.lsf.msk.msk.msrb.mxu2 %vm2453_vm4, %v2174_v0  ;;  %vm3277_vm4 = vcmask 39936  }
  0xde   : > { %1893 = vmatmul.msk.f32.gmra.mxu0 %vm493_vm2, %v481_v5 }
  0xdf   : > { %1918 = vmatpush.msk.msra.mxu2 %vm2462_vm5, %v2174_v0 }
  0xe1   : > { %1984 = vmatpush.lsf.msk.msk.msrb.mxu2 %vm2462_vm5, %v2174_v0 }
  0xe3   : > { %1919 = vmatpush.msk.msra.mxu2 %vm2470_vm6, %v2174_v0 }
  0xe5   : > { %1985 = vmatpush.lsf.msk.msk.msrb.mxu2 %vm2470_vm6, %v2174_v0 }
  0xe6   : > { %1894 = vmatmul.msk.f32.gmra.mxu0 %vm493_vm2, %v482_v8 }
  0xe7   : > { %1920 = vmatpush.msk.msra.mxu2 %vm2481_vm7, %v2174_v0 }
  0xe9   : > { %1986 = vmatpush.lsf.msk.msk.msrb.mxu2 %vm2481_vm7, %v2174_v0 }
  0xeb   : > { %1921 = vmatpush.msk.msra.mxu2 %vm2501_vm8, %v2174_v0 }
  0xed   : > { %1987 = vmatpush.lsf.msk.msk.msrb.mxu2 %vm2501_vm8, %v2174_v0 }
  0xee   : > { %1895 = vmatmul.msk.f32.gmra.mxu0 %vm493_vm2, %v483_v11  ;;  %v3297_v11 = vmov 0 }
  0xef   : > { %v3298_v11 = vsel %vm2520_vm10, 4294967295, %v3297_v11  ;;  %1922 = vmatpush.msk.msra.mxu2 %vm2509_vm9, %v2174_v0 }
  0xf1   : > { %1988 = vmatpush.lsf.msk.msk.msrb.mxu2 %vm2509_vm9, %v2174_v0 }
  0xf3   : > { %1923 = vmatpush.msk.msra.mxu2 %vm2520_vm10, %v2174_v0 }
  0xf5   : > { %1989 = vmatpush.lsf.msk.msk.msrb.mxu2 %vm2520_vm10, %v2174_v0 }
  0xf6   : > { %1896 = vmatmul.msk.f32.gmra.mxu0 %vm493_vm2, %v484_v24 }
  0xf7   : > { %1924 = vmatpush.msk.msra.mxu2 %vm2543_vm11, %v2174_v0 }
  0xf9   : > { %1990 = vmatpush.lsf.msk.msk.msrb.mxu2 %vm2543_vm11, %v2174_v0 }
  0xfb   : > { %1925 = vmatpush.msk.msra.mxu2 %vm2553_vm12, %v2174_v0 }
  0xfd   : > { %1991 = vmatpush.lsf.msk.msk.msrb.mxu2 %vm2553_vm12, %v2174_v0 }
  0xfe   : > { %1897 = vmatmul.msk.f32.gmra.mxu0 %vm493_vm2, %v485_v29  ;;  %v3303_v29 = vmov 0 }
  0xff   : > { %v3304_v29 = vsel %vm2564_vm13, 4294967295, %v3303_v29  ;;  %1926 = vmatpush.msk.msra.mxu2 %vm2564_vm13, %v2174_v0 }
 0x101   : > { %1992 = vmatpush.lsf.msk.msk.msrb.mxu2 %vm2564_vm13, %v2174_v0 }
 0x103   : > { %1927 = vmatpush.msk.msra.mxu2 %vm2576_vm14, %v2174_v0 }
 0x105   : > { %1993 = vmatpush.lsf.msk.msk.msrb.mxu2 %vm2576_vm14, %v2174_v0 }
 0x106   : > { %1898 = vmatmul.msk.f32.gmra.mxu0 %vm493_vm2, %v486_v36  ;;  %vm2635_vm2 = vcmp.eq.s32.totalorder %v2433_v59, %v2399_v17 }
 0x107   : > { %1928 = vmatpush.msk.msra.mxu2 %vm2594_vm15, %v2174_v0  ;;  %v3315_v38 = vsel %vm2635_vm2, 4294967295, %v3314_v38 }
 0x108   : > { %3316 = vst [vmem:[#allocation11_spill] sm:$0xff] %v3315_v38 }
 0x109   : > { %1994 = vmatpush.lsf.msk.msk.msrb.mxu2 %vm2594_vm15, %v2174_v0 }
 0x10b   : > { %v559_v42 = vpop.f32.mrf.mxu0  ;;  %1929 = vmatpush.msk.msra.mxu2 %vm2609_vm0, %v2174_v0 }
 0x10c   : > { %v2422_v47 = vadd.f32 %v2419_v25, %v559_v42 }
 0x10d   : > { %1995 = vmatpush.lsf.msk.msk.msrb.mxu2 %vm2609_vm0, %v2174_v0 }
 0x10e   : > { %610 = vperm.xlu0 %2026, %v2422_v47   ;;  %746 = vperm.xlu2 %2027, %v2422_v47  }
 0x10f   : > { %1930 = vmatpush.msk.msra.mxu2 %vm2623_vm1, %v2174_v0 }
 0x111   : > { %1996 = vmatpush.lsf.msk.msk.msrb.mxu2 %vm2623_vm1, %v2174_v0 }
 0x113   : > { %v562_v49 = vpop.f32.mrf.mxu0  ;;  %1931 = vmatpush.msk.msra.mxu2 %vm2635_vm2, %v2174_v0 }
 0x114   : > { %v2427_v53 = vadd.f32 %v2419_v25, %v562_v49 }
 0x115   : > { %1997 = vmatpush.lsf.msk.msk.msrb.mxu2 %vm2635_vm2, %v2174_v0 }
 0x116   : > { %2030 = vset.pattern.permute.xlu0 %v3258_v22  ;;  %2028 = vset.pattern.permute.xlu2 %v3264_v57 }
 0x117   : > { %615 = vperm.xlu1 %2024, %v2427_v53   ;;  %750 = vperm.xlu0 %2030, %v2427_v53  }
 0x118   : > { %866 = vperm.xlu2 %2028, %v2422_v47   ;;  %1980 = vllmr.1.mxu2 }
 0x11b   : > { %v565_v60 = vpop.f32.mrf.mxu0 }
 0x11c   : > { %v2437_v62 = vadd.f32 %v2419_v25, %v565_v60 }
 0x11f   : > { %2034 = vset.pattern.permute.xlu1 %v3258_v22  ;;  %2031 = vset.pattern.permute.xlu0 %v3264_v57 }
 0x120   : > { %2029 = vset.pattern.permute.xlu2 %v3262_v4  ;;  %754 = vperm.xlu1 %2034, %v2437_v62  }
 0x121   : > { %870 = vperm.xlu0 %2031, %v2427_v53   ;;  %986 = vperm.xlu2 %2029, %v2422_v47  }
 0x123   : > { %v568_v6 = vpop.f32.mrf.mxu0 }
 0x124   : > { %v2534_v15 = vadd.f32 %v2419_v25, %v568_v6 }
 0x128   : > { %2035 = vset.pattern.permute.xlu1 %v3264_v57 }
 0x129   : > { %2032 = vset.pattern.permute.xlu0 %v3262_v4  ;;  %2033 = vset.pattern.permute.xlu2 %v3260_v20 }
 0x12a   : > { %874 = vperm.xlu1 %2035, %v2437_v62   ;;  %990 = vperm.xlu0 %2032, %v2427_v53  }
 0x12b   : > { %620 = vperm.xlu2 %2033, %v2437_v62   ;;  %v571_v14 = vpop.f32.mrf.mxu0 }
 0x12c   : > { %v2581_v32 = vadd.f32 %v2419_v25, %v571_v14 }
 0x12e   : > { %3307 = vst [vmem:[#allocation10_spill] sm:$0xff] %v2581_v32 }
 0x132   : > { %2036 = vset.pattern.permute.xlu1 %v3262_v4  ;;  %2037 = vset.pattern.permute.xlu0 %v3260_v20 }
 0x133   : > { %2038 = vset.pattern.permute.xlu2 %v3258_v22  ;;  %994 = vperm.xlu1 %2036, %v2437_v62   ;;  %v574_v24 = vpop.f32.mrf.mxu0 }
 0x134   : > { %625 = vperm.xlu0 %2037, %v2534_v15   ;;  %758 = vperm.xlu2 %2038, %v2534_v15   ;;  %v2661_v17 = vadd.f32 %v2419_v25, %v574_v24 }
 0x13b   : > { %2041 = vset.pattern.permute.xlu1 %v3260_v20  ;;  %v577_v16 = vpop.f32.mrf.mxu0 }
 0x13c   : > { %2039 = vset.pattern.permute.xlu2 %v3264_v57  ;;  %630 = vperm.xlu1 %2041, %v2581_v32   ;;  %v2605_v36 = vadd.f32 %v2419_v25, %v577_v16 }
 0x13d   : > { %878 = vperm.xlu2 %2039, %v2534_v15  }
 0x13e   : > { %640 = vperm.xlu0 %2037, %v2605_v36  }
 0x143   : > { %v580_v23 = vpop.f32.mrf.mxu0 }
 0x144   : > { %2042 = vset.pattern.permute.xlu1 %v3258_v22  ;;  %v2676_v18 = vadd.f32 %v2419_v25, %v580_v23 }
 0x145   : > { %2040 = vset.pattern.permute.xlu2 %v3262_v4  ;;  %762 = vperm.xlu1 %2042, %v2581_v32  }
 0x146   : > { %998 = vperm.xlu2 %2040, %v2534_v15   ;;  %2049 = vset.pattern.permute.xlu0 %v3258_v22 }
 0x147   : > { %770 = vperm.xlu0 %2049, %v2605_v36  }
 0x14b   : > { %v583_v42 = vpop.f32.mrf.mxu0 }
 0x14c   : > { %v2697_v56 = vadd.f32 %v2419_v25, %v583_v42 }
 0x14d   : > { %2043 = vset.pattern.permute.xlu1 %v3264_v57 }
 0x14e   : > { %2045 = vset.pattern.permute.xlu2 %v3260_v20  ;;  %882 = vperm.xlu1 %2043, %v2581_v32  }
 0x14f   : > { %635 = vperm.xlu2 %2045, %v2661_v17   ;;  %2050 = vset.pattern.permute.xlu0 %v3264_v57 }
 0x150   : > { %890 = vperm.xlu0 %2050, %v2605_v36  }
 0x153   : > { %v586_v43 = vpop.f32.mrf.mxu0 }
 0x154   : > { %v2679_v48 = vadd.f32 %v2419_v25, %v586_v43 }
 0x156   : > { %2044 = vset.pattern.permute.xlu1 %v3262_v4 }
 0x157   : > { %2046 = vset.pattern.permute.xlu2 %v3258_v22  ;;  %1002 = vperm.xlu1 %2044, %v2581_v32  }
 0x158   : > { %766 = vperm.xlu2 %2046, %v2661_v17   ;;  %2051 = vset.pattern.permute.xlu0 %v3262_v4 }
 0x159   : > { %1010 = vperm.xlu0 %2051, %v2605_v36  }
 0x15b   : > { %v589_v49 = vpop.f32.mrf.mxu0 }
 0x15c   : > { %v2688_v51 = vadd.f32 %v2419_v25, %v589_v49 }
 0x15f   : > { %2052 = vset.pattern.permute.xlu1 %v3260_v20 }
 0x160   : > { %2047 = vset.pattern.permute.xlu2 %v3264_v57  ;;  %645 = vperm.xlu1 %2052, %v2676_v18  }
 0x161   : > { %886 = vperm.xlu2 %2047, %v2661_v17   ;;  %2060 = vset.pattern.permute.xlu0 %v3260_v20 }
 0x162   : > { %655 = vperm.xlu0 %2060, %v2679_v48  }
 0x163   : > { %v592_v55 = vpop.f32.mrf.mxu0 }
 0x164   : > { %v2700_v59 = vadd.f32 %v2419_v25, %v592_v55 }
 0x168   : > { %2053 = vset.pattern.permute.xlu1 %v3258_v22  ;;  %v747_v52 = vpop.permute.xlu2 %746 }
 0x169   : > { %2048 = vset.pattern.permute.xlu2 %v3262_v4  ;;  %774 = vperm.xlu1 %2053, %v2676_v18   ;;  %v809_v55 = vsel %vm2635_vm2, %v747_v52, -1e+30 }
 0x16a   : > { %1006 = vperm.xlu2 %2048, %v2661_v17   ;;  %2065 = vset.pattern.permute.xlu0 %v3258_v22 }
 0x16b   : > { %786 = vperm.xlu0 %2065, %v2688_v51   ;;  %v595_v61 = vpop.f32.mrf.mxu0 }
 0x16c   : > { %v2709_v0 = vadd.f32 %v2419_v25, %v595_v61 }
 0x171   : > { %2054 = vset.pattern.permute.xlu1 %v3264_v57 }
 0x172   : > { %2056 = vset.pattern.permute.xlu2 %v3260_v20  ;;  %894 = vperm.xlu1 %2054, %v2676_v18   ;;  %v867_v60 = vpop.permute.xlu2 %866 }
 0x173   : > { %650 = vperm.xlu2 %2056, %v2697_v56   ;;  %2070 = vset.pattern.permute.xlu0 %v3264_v57  ;;  %v598_v2 = vpop.f32.mrf.mxu0 }
 0x174   : > { %910 = vperm.xlu0 %2070, %v2700_v59   ;;  %v2720_v14 = vadd.f32 %v2419_v25, %v598_v2 }
 0x17a   : > { %2055 = vset.pattern.permute.xlu1 %v3262_v4 }
 0x17b   : > { %2058 = vset.pattern.permute.xlu2 %v3264_v57  ;;  %1014 = vperm.xlu1 %2055, %v2676_v18   ;;  %v2714_v1 = vpop.permute.xlu2 %986  ;;  %v601_v49 = vpop.f32.mrf.mxu0 }
 0x17c   : > { %898 = vperm.xlu2 %2058, %v2697_v56   ;;  %2072 = vset.pattern.permute.xlu0 %v3260_v20 }
 0x17d   : > { %670 = vperm.xlu0 %2072, %v2709_v0  }
 0x180   : > { %v611_v6 = vpop.permute.xlu0 %610 }
 0x181   : > { %v688_v24 = vsel %vm2635_vm2, %v611_v6, -1e+30 }
 0x182   : > { %v2733_v42 = vsel %vm3277_vm4, %v688_v24, -inf }
 0x183   : > { %2057 = vset.pattern.permute.xlu1 %v3258_v22 }
 0x184   : > { %2061 = vset.pattern.permute.xlu2 %v3258_v22  ;;  %778 = vperm.xlu1 %2057, %v2697_v56  }
 0x185   : > { %782 = vperm.xlu2 %2061, %v2679_v48   ;;  %v621_v16 = vpop.permute.xlu2 %620  ;;  %2077 = vset.pattern.permute.xlu0 %v3258_v22  ;;  %v825_v22 = vsel %vm3277_vm4, %v809_v55, -inf }
 0x186   : > { %v690_v23 = vsel %vm2609_vm0, %v621_v16, -1e+30  ;;  %798 = vperm.xlu0 %2077, %v2720_v14  }
 0x187   : > { %v2736_v43 = vsel %vm3277_vm4, %v690_v23, -inf  ;;  %v2749_v23 = vadd.f32 %v2419_v25, %v601_v49 }
 0x189   : > { %v2742_v2 = vpop.permute.xlu1 %615  ;;  %v751_v6 = vpop.permute.xlu0 %750 }
 0x18a   : > { %v810_v16 = vsel %vm2623_vm1, %v751_v6, -1e+30 }
 0x18b   : > { %v826_v24 = vsel %vm3277_vm4, %v810_v16, -inf  ;;  %v929_v16 = vsel %vm2635_vm2, %v867_v60, -1e+30 }
 0x18c   : > { %v832_v20 = vmax.f32 %v826_v24, %v825_v22  ;;  %2059 = vset.pattern.permute.xlu1 %v3262_v4  ;;  %v604_v22 = vpop.f32.mrf.mxu0 }
 0x18d   : > { %2063 = vset.pattern.permute.xlu2 %v3262_v4  ;;  %1018 = vperm.xlu1 %2059, %v2697_v56   ;;  %v2772_v3 = vadd.f32 %v2419_v25, %v604_v22 }
 0x18e   : > { %1022 = vperm.xlu2 %2063, %v2679_v48   ;;  %v759_v52 = vpop.permute.xlu2 %758  ;;  %2081 = vset.pattern.permute.xlu0 %v3264_v57 }
 0x18f   : > { %v812_v55 = vsel %vm2594_vm15, %v759_v52, -1e+30  ;;  %922 = vperm.xlu0 %2081, %v2749_v23  }
 0x190   : > { %v828_v49 = vsel %vm3277_vm4, %v812_v55, -inf }
 0x191   : > { %v2760_v6 = vmax.f32 %v828_v49, %v832_v20  ;;  %v945_v20 = vsel %vm3277_vm4, %v929_v16, -inf  ;;  %v3317_v49 = vmov 2  }
 0x192   : > { %v755_v24 = vpop.permute.xlu1 %754 }
 0x193   : > { %v811_v61 = vsel %vm2609_vm0, %v755_v24, -1e+30  ;;  %v871_v4 = vpop.permute.xlu0 %870 }
 0x194   : > { %v2767_v57 = vsel %vm3277_vm4, %v811_v61, -inf  ;;  %v930_v52 = vsel %vm2623_vm1, %v871_v4, -1e+30  ;;  %v3318_v61 = vmov 3  }
 0x195   : > { %v946_v60 = vsel %vm3277_vm4, %v930_v52, -inf  ;;  %2062 = vset.pattern.permute.xlu1 %v3317_v49  ;;  %v1049_v52 = vsel %vm2635_vm2, %v2714_v1, -1e+30 }
 0x196   : > { %v952_v24 = vmax.f32 %v946_v60, %v945_v20  ;;  %2066 = vset.pattern.permute.xlu2 %v3317_v49  ;;  %902 = vperm.xlu1 %2062, %v2679_v48   ;;  %v1065_v63 = vsel %vm3277_vm4, %v1049_v52, -inf }
 0x197   : > { %906 = vperm.xlu2 %2066, %v2688_v51   ;;  %v879_v4 = vpop.permute.xlu2 %878  ;;  %2087 = vset.pattern.permute.xlu0 %v3318_v61 }
 0x198   : > { %v932_v25 = vsel %vm2594_vm15, %v879_v4, -1e+30  ;;  %1046 = vperm.xlu0 %2087, %v2772_v3  }
 0x199   : > { %v948_v22 = vsel %vm3277_vm4, %v932_v25, -inf }
 0x19a   : > { %v2787_v16 = vmax.f32 %v948_v22, %v952_v24  ;;  %v3319_v22 = vmov 0  }
 0x19b   : > { %v1245_v1 = vsel %vm264_vm3, 1, %v3319_v22  ;;  %vm269_vm3 = vcmp.lt.s32.totalorder %v2367_v50, 5 }
 0x19c   : > { %v875_v20 = vpop.permute.xlu1 %874  ;;  %v991_v60 = vpop.permute.xlu0 %990  ;;  %v1250_v39 = vsel %vm269_vm3, 1, %v3319_v22  ;;  %vm272_vm3 = vcmp.lt.s32.totalorder %v2373_v54, 5 }
 0x19d   : > { %v931_v55 = vsel %vm2609_vm0, %v875_v20, -1e+30  ;;  %v1050_v4 = vsel %vm2623_vm1, %v991_v60, -1e+30 }
 0x19e   : > { %v2799_v25 = vsel %vm3277_vm4, %v931_v55, -inf  ;;  %v1066_v24 = vsel %vm3277_vm4, %v1050_v4, -inf  ;;  %2064 = vset.pattern.permute.xlu1 %v3319_v22 }
 0x19f   : > { %v1072_v38 = vmax.f32 %v1066_v24, %v1065_v63  ;;  %2068 = vset.pattern.permute.xlu2 %v3319_v22  ;;  %660 = vperm.xlu1 %2064, %v2688_v51  }
 0x1a0   : > { %665 = vperm.xlu2 %2068, %v2700_v59   ;;  %v999_v52 = vpop.permute.xlu2 %998  ;;  %2090 = vset.pattern.permute.xlu0 %v3319_v22 }
 0x1a1   : > { %v1052_v55 = vsel %vm2594_vm15, %v999_v52, -1e+30  ;;  %1270 = vperm.xlu0 %2090, %v1245_v1  }
 0x1a2   : > { %v1068_v20 = vsel %vm3277_vm4, %v1052_v55, -inf  ;;  %v3320_v55 = vmax.f32 %v2733_v42, %v2736_v43  ;;  %v1253_v43 = vsel %vm272_vm3, 1, %v3319_v22  ;;  %vm275_vm3 = vcmp.lt.s32.totalorder %v2379_v58, 5 }
 0x1a3   : > { %v2813_v60 = vmax.f32 %v1068_v20, %v1072_v38  ;;  %v689_v38 = vsel %vm2623_vm1, %v2742_v2, -1e+30 }
 0x1a5   : > { %v995_v63 = vpop.permute.xlu1 %994 }
 0x1a6   : > { %v1051_v4 = vsel %vm2609_vm0, %v995_v63, -1e+30  ;;  %v626_v24 = vpop.permute.xlu0 %625 }
 0x1a7   : > { %v2820_v32 = vsel %vm3277_vm4, %v1051_v4, -inf  ;;  %v691_v52 = vsel %vm2594_vm15, %v626_v24, -1e+30  ;;  %2067 = vset.pattern.permute.xlu1 %v3318_v61  ;;  %v706_v4 = vsel %vm3277_vm4, %v689_v38, -inf }
 0x1a8   : > { %v1074_v50 = vmax.f32 %v2820_v32, %v2813_v60  ;;  %v708_v1 = vsel %vm3277_vm4, %v691_v52, -inf  ;;  %2071 = vset.pattern.permute.xlu2 %v3318_v61  ;;  %1026 = vperm.xlu1 %2067, %v2688_v51  }
 0x1a9   : > { %v714_v20 = vmax.f32 %v708_v1, %v3320_v55  ;;  %1030 = vperm.xlu2 %2071, %v2700_v59   ;;  %v636_v63 = vpop.permute.xlu2 %635  ;;  %1285 = vperm.xlu0 %2090, %v1250_v39   ;;  %v3321_v39 = vmov 1  }
 0x1aa   : > { %v693_v2 = vsel %vm2564_vm13, %v636_v63, -1e+30 }
 0x1ab   : > { %v711_v32 = vsel %vm3277_vm4, %v693_v2, -inf  ;;  %v3322_v2 = vmax.f32 %v2767_v57, %v2760_v6 }
 0x1ac   : > { %v712_v60 = vmax.f32 %v706_v4, %v711_v32 }
 0x1ae   : > { %v718_v24 = vmax.f32 %v712_v60, %v714_v20  ;;  %v631_v52 = vpop.permute.xlu1 %630 }
 0x1af   : > { %v692_v42 = vsel %vm2576_vm14, %v631_v52, -1e+30 }
 0x1b0   : > { %v709_v1 = vsel %vm3277_vm4, %v692_v42, -inf  ;;  %2069 = vset.pattern.permute.xlu1 %v3321_v39  ;;  %v641_v55 = vpop.permute.xlu0 %640 }
 0x1b1   : > { %v716_v63 = vmax.f32 %v709_v1, %v718_v24  ;;  %2073 = vset.pattern.permute.xlu2 %v3321_v39  ;;  %790 = vperm.xlu1 %2069, %v2700_v59   ;;  %v1256_v24 = vsel %vm275_vm3, 1, %v3319_v22  ;;  %v3323_v1 = vmax.f32 %v2799_v25, %v2787_v16  ;;  %vm261_vm3 = vcmp.lt.s32.totalorder %v2328_v33, 5 }
 0x1b2   : > { %794 = vperm.xlu2 %2073, %v2709_v0   ;;  %v767_v54 = vpop.permute.xlu2 %766  ;;  %1294 = vperm.xlu0 %2090, %v1253_v43  }
 0x1b3   : > { %v814_v38 = vsel %vm2564_vm13, %v767_v54, -1e+30 }
 0x1b4   : > { %v831_v20 = vsel %vm3277_vm4, %v814_v38, -inf }
 0x1b5   : > { %v2856_v4 = vmax.f32 %v831_v20, %v3322_v2 }
 0x1b7   : > { %v763_v32 = vpop.permute.xlu1 %762 }
 0x1b8   : > { %v813_v60 = vsel %vm2576_vm14, %v763_v32, -1e+30 }
 0x1b9   : > { %v2863_v52 = vsel %vm3277_vm4, %v813_v60, -inf  ;;  %2074 = vset.pattern.permute.xlu1 %v3317_v49  ;;  %v771_v42 = vpop.permute.xlu0 %770 }
 0x1ba   : > { %v842_v43 = vmax.f32 %v2863_v52, %v2856_v4  ;;  %2075 = vset.pattern.permute.xlu2 %v3318_v61  ;;  %914 = vperm.xlu1 %2074, %v2709_v0   ;;  %v694_v52 = vsel %vm2553_vm12, %v641_v55, -1e+30 }
 0x1bb   : > { %1303 = vperm.xlu0 %2090, %v1256_v24   ;;  %1034 = vperm.xlu2 %2075, %v2709_v0   ;;  %v887_v58 = vpop.permute.xlu2 %886 }
 0x1bc   : > { %v934_v57 = vsel %vm2564_vm13, %v887_v58, -1e+30 }
 0x1bd   : > { %v951_v6 = vsel %vm3277_vm4, %v934_v57, -inf }
 0x1be   : > { %v958_v54 = vmax.f32 %v951_v6, %v3323_v1  ;;  %v713_v6 = vsel %vm3277_vm4, %v694_v52, -inf }
 0x1bf   : > { %v720_v55 = vmax.f32 %v713_v6, %v716_v63 }
 0x1c0   : > { %v883_v38 = vpop.permute.xlu1 %882 }
 0x1c1   : > { %v933_v20 = vsel %vm2576_vm14, %v883_v38, -1e+30 }
 0x1c2   : > { %v949_v2 = vsel %vm3277_vm4, %v933_v20, -inf  ;;  %2076 = vset.pattern.permute.xlu1 %v3319_v22  ;;  %v891_v4 = vpop.permute.xlu0 %890 }
 0x1c3   : > { %v956_v32 = vmax.f32 %v949_v2, %v958_v54  ;;  %1570 = vrot.lane.b32.xlu0 %v2720_v14, %s2176_s10  ;;  %2078 = vset.pattern.permute.xlu2 %v3317_v49 }
 0x1c4   : > { %675 = vperm.xlu1 %2076, %v2720_v14   ;;  %918 = vperm.xlu2 %2078, %v2720_v14   ;;  %v1007_v16 = vpop.permute.xlu2 %1006 }
 0x1c5   : > { %v1054_v25 = vsel %vm2564_vm13, %v1007_v16, -1e+30  ;;  %vm267_vm13 = vcmp.lt.s32.totalorder %v2334_v35, 5 }
 0x1c6   : > { %v1071_v60 = vsel %vm3277_vm4, %v1054_v25, -inf  ;;  %v935_v25 = vsel %vm2553_vm12, %v891_v4, -1e+30  ;;  %v815_v4 = vsel %vm2553_vm12, %v771_v42, -1e+30 }
 0x1c7   : > { %v2889_v24 = vmax.f32 %v1071_v60, %v1074_v50  ;;  %v953_v52 = vsel %vm3277_vm4, %v935_v25, -inf }
 0x1c9   : > { %v1003_v58 = vpop.permute.xlu1 %1002 }
 0x1ca   : > { %v1053_v57 = vsel %vm2576_vm14, %v1003_v58, -1e+30 }
 0x1cb   : > { %v1069_v1 = vsel %vm3277_vm4, %v1053_v57, -inf  ;;  %1564 = vrot.lane.b32.xlu0 %v2688_v51, %s2176_s10  ;;  %v1011_v54 = vpop.permute.xlu0 %1010 }
 0x1cc   : > { %v1076_v38 = vmax.f32 %v1069_v1, %v2889_v24  ;;  %2080 = vset.pattern.permute.xlu1 %v3321_v39  ;;  %2079 = vset.pattern.permute.xlu2 %v3319_v22  ;;  %v964_v1 = vmax.f32 %v956_v32, %v953_v52 }
 0x1cd   : > { %802 = vperm.xlu1 %2080, %v2749_v23   ;;  %680 = vperm.xlu2 %2079, %v2749_v23   ;;  %v651_v50 = vpop.permute.xlu2 %650 }
 0x1ce   : > { %v696_v20 = vsel %vm2520_vm10, %v651_v50, -1e+30 }
 0x1cf   : > { %v717_v2 = vsel %vm3277_vm4, %v696_v20, -inf  ;;  %v833_v20 = vsel %vm3277_vm4, %v815_v4, -inf }
 0x1d0   : > { %v726_v16 = vmax.f32 %v717_v2, %v720_v55 }
 0x1d2   : > { %v646_v60 = vpop.permute.xlu1 %645 }
 0x1d3   : > { %v695_v24 = vsel %vm2543_vm11, %v646_v60, -1e+30  ;;  %1558 = vrot.lane.b32.xlu0 %v2676_v18, %s2176_s10 }
 0x1d4   : > { %v715_v63 = vsel %vm3277_vm4, %v695_v24, -inf  ;;  %v2919_v57 = vpop.permute.xlu0 %655  ;;  %v1055_v24 = vsel %vm2553_vm12, %v1011_v54, -1e+30  ;;  %vm260_vm12 = vcmp.lt.s32.totalorder %v2300_v19, 5 }
 0x1d5   : > { %v2915_v58 = vmax.f32 %v715_v63, %v726_v16  ;;  %2082 = vset.pattern.permute.xlu1 %v3319_v22  ;;  %2083 = vset.pattern.permute.xlu2 %v3321_v39  ;;  %v2931_v16 = vmax.f32 %v833_v20, %v842_v43  ;;  %v1242_v63 = vsel %vm261_vm3, 1, %v3319_v22  ;;  %v1073_v4 = vsel %vm3277_vm4, %v1055_v24, -inf }
 0x1d6   : > { %685 = vperm.xlu1 %2082, %v2772_v3   ;;  %806 = vperm.xlu2 %2083, %v2772_v3   ;;  %v899_v6 = vpop.permute.xlu2 %898  ;;  %v1078_v54 = vmax.f32 %v1073_v4, %v1076_v38  ;;  %vm263_vm3 = vcmp.lt.s32.totalorder %v2309_v21, 5  ;;  %v1241_v24 = vsel %vm260_vm12, 1, %v3319_v22  ;;  %vm262_vm12 = vcmp.lt.s32.totalorder %v2320_v27, 5 }
 0x1d7   : > { %v937_v50 = vsel %vm2520_vm10, %v899_v6, -1e+30  ;;  %v1244_v38 = vsel %vm263_vm3, 1, %v3319_v22  ;;  %vm266_vm3 = vcmp.lt.s32.totalorder %v2353_v44, 5 }
 0x1d8   : > { %v957_v55 = vsel %vm3277_vm4, %v937_v50, -inf }
 0x1d9   : > { %v962_v2 = vmax.f32 %v957_v55, %v964_v1 }
 0x1db   : > { %1554 = vrot.lane.b32.xlu0 %v2661_v17, %s2176_s10  ;;  %v775_v39 = vpop.permute.xlu1 %774 }
 0x1dc   : > { %v816_v42 = vsel %vm2543_vm11, %v775_v39, -1e+30 }
 0x1dd   : > { %v2936_v25 = vsel %vm3277_vm4, %v816_v42, -inf  ;;  %v2943_v60 = vpop.permute.xlu0 %786 }
 0x1de   : > { %v838_v32 = vmax.f32 %v2936_v25, %v2931_v16  ;;  %2084 = vset.pattern.permute.xlu1 %v3317_v49  ;;  %2086 = vset.pattern.permute.xlu2 %v3318_v61 }
 0x1df   : > { %926 = vperm.xlu1 %2084, %v2772_v3   ;;  %1042 = vperm.xlu2 %2086, %v2749_v23   ;;  %v2946_v43 = vpop.permute.xlu2 %782 }
 0x1e3   : > { %1550 = vrot.lane.b32.xlu0 %v2534_v15, %s2176_s10 }
 0x1e4   : > { %v895_v52 = vpop.permute.xlu1 %894 }
 0x1e5   : > { %v936_v49 = vsel %vm2543_vm11, %v895_v52, -1e+30 }
 0x1e6   : > { %v955_v6 = vsel %vm3277_vm4, %v936_v49, -inf  ;;  %v911_v50 = vpop.permute.xlu0 %910 }
 0x1e7   : > { %v970_v1 = vmax.f32 %v962_v2, %v955_v6  ;;  %2085 = vset.pattern.permute.xlu1 %v3318_v61  ;;  %2089 = vset.pattern.permute.xlu2 %v3319_v22  ;;  %v940_v61 = vsel %vm2481_vm7, %v911_v50, -1e+30 }
 0x1e8   : > { %1038 = vperm.xlu1 %2085, %v2720_v14   ;;  %v1023_v33 = vpop.permute.xlu2 %1022  ;;  %1261 = vperm.xlu2 %2089, %v1242_v63   ;;  %v963_v52 = vsel %vm3277_vm4, %v940_v61, -inf }
 0x1e9   : > { %v1058_v55 = vsel %vm2509_vm9, %v1023_v33, -1e+30  ;;  %v960_v63 = vmax.f32 %v963_v52, %v970_v1 }
 0x1ea   : > { %v1079_v20 = vsel %vm3277_vm4, %v1058_v55, -inf  ;;  %v1243_v55 = vsel %vm262_vm12, 1, %v3319_v22  ;;  %vm271_vm12 = vcmp.lt.s32.totalorder %v2344_v40, 5 }
 0x1eb   : > { %v1084_v39 = vmax.f32 %v1079_v20, %v1078_v54  ;;  %1548 = vrot.lane.b32.xlu0 %v2437_v62, %s2176_s10  ;;  %v1247_v54 = vsel %vm266_vm3, 1, %v3319_v22  ;;  %vm3324_vm3 = vcmask 39936  }
 0x1ed   : > { %v1015_v2 = vpop.permute.xlu1 %1014 }
 0x1ee   : > { %v1056_v42 = vsel %vm2543_vm11, %v1015_v2, -1e+30  ;;  %vm268_vm11 = vcmp.lt.s32.totalorder %v2331_v34, 5  ;;  %v1252_v2 = vsel %vm271_vm12, 1, %v3319_v22 }
 0x1ef   : > { %v1075_v21 = vsel %vm3277_vm4, %v1056_v42, -inf  ;;  %v1249_v27 = vsel %vm268_vm11, 1, %v3319_v22  ;;  %vm270_vm11 = vcmp.lt.s32.totalorder %v2347_v41, 5 }
 0x1f0   : > { %v2976_v49 = vmax.f32 %v1084_v39, %v1075_v21  ;;  %2088 = vset.pattern.permute.xlu1 %v3319_v22  ;;  %1267 = vperm.xlu2 %2089, %v1244_v38   ;;  %v1248_v38 = vsel %vm267_vm13, 1, %v3319_v22  ;;  %v1251_v40 = vsel %vm270_vm11, 1, %v3319_v22  ;;  %vm3325_vm13 = vcmask 39936  }
 0x1f1   : > { %1258 = vperm.xlu1 %2088, %v1241_v24   ;;  %v907_v19 = vpop.permute.xlu2 %906  ;;  %vm3326_vm12 = vmmov %vm3325_vm13 }
 0x1f2   : > { %v939_v4 = vsel %vm2501_vm8, %v907_v19, -1e+30 }
 0x1f3   : > { %v961_v6 = vsel %vm3277_vm4, %v939_v4, -inf  ;;  %1546 = vrot.lane.b32.xlu0 %v2427_v53, %s2176_s10  ;;  %vm265_vm4 = vcmp.lt.s32.totalorder %v2317_v26, 5 }
 0x1f4   : > { %v2986_v33 = vmax.f32 %v960_v63, %v961_v6  ;;  %v1246_v44 = vsel %vm265_vm4, 1, %v3319_v22  ;;  %vm274_vm4 = vcmp.lt.s32.totalorder %v2359_v46, 5 }
 0x1f5   : > { %v1255_v24 = vsel %vm274_vm4, 1, %v3319_v22  ;;  %vm3327_vm4 = vmmov %vm3326_vm12 }
 0x1f6   : > { %v779_v50 = vpop.permute.xlu1 %778  ;;  %vm3328_vm11 = vmmov %vm3327_vm4 }
 0x1f8   : > { %1276 = vperm.xlu2 %2089, %v1247_v54  }
 0x1f9   : > { %1264 = vperm.xlu1 %2088, %v1243_v55  }
 0x1fa   : > { %v2991_v1 = vpop.permute.xlu2 %665 }
 0x1fb   : > { %1544 = vrot.lane.b32.xlu0 %v2422_v47, %s2176_s10 }
 0x1ff   : > { %v1019_v20 = vpop.permute.xlu1 %1018 }
 0x200   : > { %v1057_v39 = vsel %vm2520_vm10, %v1019_v20, -1e+30  ;;  %1282 = vperm.xlu2 %2089, %v1249_v27  }
 0x201   : > { %v3001_v61 = vsel %vm3324_vm3, %v1057_v39, -inf  ;;  %1273 = vperm.xlu1 %2088, %v1246_v44   ;;  %vm273_vm3 = vcmp.lt.s32.totalorder %v2356_v45, 5  ;;  %v671_v45 = vpop.permute.xlu0 %670  ;;  %v817_v44 = vsel %vm2520_vm10, %v779_v50, -1e+30  ;;  %v3329_v50 = vld [vmem:[#allocation10_spill] sm:$0xff] }
 0x202   : > { %v1086_v34 = vmax.f32 %v3001_v61, %v2976_v49  ;;  %v1254_v21 = vsel %vm273_vm3, 1, %v3319_v22  ;;  %v819_v22 = vsel %vm2501_vm8, %v2943_v60, -1e+30  ;;  %v818_v60 = vsel %vm2509_vm9, %v2946_v43, -1e+30  ;;  %vm3330_vm3 = vmmov %vm3327_vm4 }
 0x203   : > { %v3007_v26 = vpop.permute.xlu2 %1030  ;;  %v841_v54 = vsel %vm3325_vm13, %v819_v22, -inf  ;;  %v839_v39 = vsel %vm3326_vm12, %v818_v60, -inf  ;;  %vm3333_vm12 = vmmov %vm3330_vm3 }
 0x204   : > { %v848_v27 = vmax.f32 %v841_v54, %v838_v32  ;;  %vm3336_vm10 = vmmov %vm3330_vm3 }
 0x208   : > { %1291 = vperm.xlu2 %2089, %v1252_v2   ;;  %v3011_v42 = vpop.permute.xlu1 %902  ;;  %v837_v2 = vsel %vm3327_vm4, %v817_v44, -inf  ;;  %vm3334_vm4 = vmmov %vm3330_vm3 }
 0x209   : > { %1279 = vperm.xlu1 %2088, %v1248_v38   ;;  %v799_v55 = vpop.permute.xlu0 %798  ;;  %v846_v38 = vmax.f32 %v839_v39, %v848_v27  ;;  %v700_v27 = vsel %vm2470_vm6, %v671_v45, -1e+30 }
 0x20a   : > { %v822_v20 = vsel %vm2462_vm5, %v799_v55, -1e+30  ;;  %v3331_v55 = vld [vmem:[#allocation8_spill] sm:$0xff]  ;;  %v725_v39 = vsel %vm3336_vm10, %v700_v27, -inf  ;;  %vm3340_vm10 = vmmov %vm3330_vm3 }
 0x20b   : > { %v847_v25 = vsel %vm3328_vm11, %v822_v20, -inf  ;;  %vm3332_vm13 = vnez %v3331_v55  ;;  %v699_v20 = vsel %vm2481_vm7, %v2991_v1, -1e+30  ;;  %vm3335_vm11 = vmmov %vm3330_vm3 }
 0x20c   : > { %v795_v52 = vpop.permute.xlu2 %794 }
 0x210   : > { %1300 = vperm.xlu2 %2089, %v1255_v24   ;;  %v821_v24 = vsel %vm2470_vm6, %v795_v52, -1e+30 }
 0x211   : > { %1288 = vperm.xlu1 %2088, %v1251_v40   ;;  %v661_v35 = vpop.permute.xlu1 %660  ;;  %v853_v40 = vmax.f32 %v846_v38, %v837_v2  ;;  %v845_v22 = vsel %vm3330_vm3, %v821_v24, -inf }
 0x212   : > { %v698_v24 = vsel %vm2501_vm8, %v661_v35, -1e+30 }
 0x213   : > { %v844_v54 = vmax.f32 %v847_v25, %v853_v40  ;;  %v723_v25 = vsel %vm3330_vm3, %v699_v20, -inf  ;;  %v3337_v40 = vld [vmem:[#allocation9_spill] sm:$0xff] }
 0x215   : > { %v3021_v19 = vpop.permute.xlu2 %1034  ;;  %v852_v44 = vmax.f32 %v844_v54, %v845_v22  ;;  %v923_v54 = vpop.permute.xlu0 %922 }
 0x218   : > { %1572 = vrot.lane.b32.xlu2 %v2749_v23, %s2176_s10 }
 0x219   : > { %1297 = vperm.xlu1 %2088, %v1254_v21   ;;  %v697_v21 = vsel %vm2509_vm9, %v2919_v57, -1e+30 }
 0x21a   : > { %v3023_v46 = vpop.permute.xlu1 %1026 }
 0x21e   : > { %v3029_v41 = vpop.permute.xlu2 %918 }
 0x220   : > { %1566 = vrot.lane.b32.xlu2 %v2700_v59, %s2176_s10 }
 0x221   : > { %1568 = vrot.lane.b32.xlu1 %v2709_v0, %s2176_s10 }
 0x223   : > { %v791_v63 = vpop.permute.xlu1 %790 }
 0x224   : > { %v820_v43 = vsel %vm2481_vm7, %v791_v63, -1e+30  ;;  %v719_v63 = vsel %vm3334_vm4, %v697_v21, -inf  ;;  %vm3339_vm4 = vmmov %vm3330_vm3 }
 0x225   : > { %v843_v60 = vsel %vm3333_vm12, %v820_v43, -inf  ;;  %v722_v38 = vmax.f32 %v719_v63, %v2915_v58  ;;  %vm3338_vm12 = vnez %v3337_v40 }
 0x226   : > { %v850_v2 = vmax.f32 %v843_v60, %v852_v44  ;;  %v943_v20 = vsel %vm3338_vm12, %v923_v54, -1e+30  ;;  %v1047_v54 = vpop.permute.xlu0 %1046 }
 0x227   : > { %v681_v6 = vpop.permute.xlu2 %680  ;;  %v730_v21 = vmax.f32 %v722_v38, %v725_v39 }
 0x228   : > { %1560 = vrot.lane.b32.xlu2 %v2697_v56, %s2176_s10  ;;  %v702_v1 = vsel %vm3338_vm12, %v681_v6, -1e+30 }
 0x229   : > { %1562 = vrot.lane.b32.xlu1 %v2679_v48, %s2176_s10  ;;  %v728_v27 = vmax.f32 %v723_v25, %v730_v21 }
 0x22c   : > { %v3038_v4 = vpop.permute.xlu1 %914 }
 0x230   : > { %1556 = vrot.lane.b32.xlu2 %v2605_v36, %s2176_s10  ;;  %v807_v32 = vpop.permute.xlu2 %806 }
 0x231   : > { %1574 = vrot.lane.b32.xlu1 %v2772_v3, %s2176_s10  ;;  %v824_v52 = vsel %vm3332_vm13, %v807_v32, -1e+30 }
 0x232   : > { %v851_v57 = vsel %vm3335_vm11, %v824_v52, -inf  ;;  %v721_v52 = vsel %vm3340_vm10, %v698_v24, -inf  ;;  %vm3341_vm11 = vmmov %vm3330_vm3 }
 0x233   : > { %v854_v32 = vmax.f32 %v850_v2, %v851_v57  ;;  %v729_v60 = vsel %vm3341_vm11, %v702_v1, -inf  ;;  %v733_v44 = vmax.f32 %v721_v52, %v728_v27  ;;  %v938_v2 = vsel %vm2509_vm9, %v3011_v42, -1e+30  ;;  %vm3343_vm10 = vmmov %vm3330_vm3 }
 0x234   : > { %vm3344_vm11 = vmmov %vm3330_vm3  ;;  %v941_v52 = vsel %vm2470_vm6, %v3038_v4, -1e+30  ;;  %v1060_v27 = vsel %vm2481_vm7, %v3007_v26, -1e+30  ;;  %v1061_v26 = vsel %vm2470_vm6, %v3021_v19, -1e+30 }
 0x235   : > { %v732_v39 = vmax.f32 %v729_v60, %v733_v44  ;;  %v959_v1 = vsel %vm3344_vm11, %v938_v2, -inf  ;;  %vm3346_vm11 = vmmov %vm3330_vm3 }
 0x236   : > { %v676_v16 = vpop.permute.xlu1 %675  ;;  %v1083_v4 = vsel %vm3346_vm11, %v1060_v27, -inf  ;;  %vm3348_vm11 = vmmov %vm3330_vm3 }
 0x237   : > { %v701_v35 = vsel %vm2462_vm5, %v676_v16, -1e+30 }
 0x238   : > { %1552 = vrot.lane.b32.xlu2 %v3329_v50, %s2176_s10  ;;  %v727_v57 = vsel %vm3330_vm3, %v701_v35, -inf  ;;  %v607_v35 = vld [vmem:[#allocation2] sm:$0xf] }
 0x239   : > { %v734_v16 = vmax.f32 %v727_v57, %v732_v39 }
 0x23f   : > { %v803_v45 = vpop.permute.xlu1 %802 }
 0x240   : > { %v823_v43 = vsel %vm3338_vm12, %v803_v45, -1e+30 }
 0x241   : > { %v849_v22 = vsel %vm3339_vm4, %v823_v43, -inf  ;;  %vm3342_vm4 = vmmov %vm3330_vm3 }
 0x242   : > { %v855_v58 = vmax.f32 %v849_v22, %v854_v32  ;;  %v969_v45 = vsel %vm3342_vm4, %v943_v20, -inf  ;;  %v942_v32 = vsel %vm2462_vm5, %v3029_v41, -1e+30  ;;  %v1064_v20 = vsel %vm3332_vm13, %v1047_v54, -1e+30  ;;  %vm3345_vm4 = vmmov %vm3330_vm3 }
 0x243   : > { %v966_v42 = vmax.f32 %v969_v45, %v2986_v33  ;;  %v967_v41 = vsel %vm3330_vm3, %v942_v32, -inf  ;;  %v965_v33 = vsel %vm3345_vm4, %v941_v52, -inf  ;;  %v1082_v32 = vmax.f32 %v1083_v4, %v1086_v34  ;;  %vm3347_vm4 = vmmov %vm3330_vm3 }
 0x244   : > { %v856_v63 = vrot.slane %v855_v58, 4 }
 0x246   : > { %v857_v6 = vmax.f32 %v855_v58, %v856_v63  ;;  %v973_v63 = vmax.f32 %v966_v42, %v959_v1  ;;  %v1085_v1 = vsel %vm3348_vm11, %v1061_v26, -inf  ;;  %vm983_vm11 = vcmask 34818  }
 0x248   : > { %v858_v38 = vrot.slane %v857_v6, 2  ;;  %v686_v24 = vpop.permute.xlu1 %685 }
 0x249   : > { %v703_v25 = vsel %vm3332_vm13, %v686_v24, -1e+30  ;;  %v1091_v24 = vsel %vm3330_vm3, %v1064_v20, -inf }
 0x24a   : > { %v859_v43 = vmax.f32 %v857_v6, %v858_v38  ;;  %v731_v21 = vsel %vm3343_vm10, %v703_v25, -inf  ;;  %vm863_vm10 = vcmask 33793   ;;  %v972_v6 = vmax.f32 %v967_v41, %v973_v63 }
 0x24b   : > { %v735_v22 = vmax.f32 %v731_v21, %v734_v16  ;;  %v1043_v16 = vpop.permute.xlu2 %1042  ;;  %v1090_v42 = vmax.f32 %v1082_v32, %v1091_v24 }
 0x24c   : > { %v860_v58 = vrot.slane %v859_v43, 1  ;;  %v974_v45 = vmax.f32 %v965_v33, %v972_v6  ;;  %v1063_v54 = vsel %vm3338_vm12, %v1043_v16, -1e+30 }
 0x24d   : > { %v736_v60 = vrot.slane %v735_v22, 4  ;;  %v1094_v49 = vmax.f32 %v1090_v42, %v1085_v1  ;;  %v1089_v34 = vsel %vm3330_vm3, %v1063_v54, -inf }
 0x24e   : > { %v861_v44 = vmax.f32 %v859_v43, %v860_v58  ;;  %v1059_v43 = vsel %vm2501_vm8, %v3023_v46, -1e+30 }
 0x24f   : > { %v737_v57 = vmax.f32 %v735_v22, %v736_v60 }
 0x250   : > { %v862_v39 = vmax.f32 %v607_v35, %v861_v44 }
 0x251   : > { %v738_v2 = vrot.slane %v737_v57, 2  ;;  %v927_v38 = vpop.permute.xlu1 %926 }
 0x252   : > { %864 = vst.msk [vmem:[#allocation2] sm:$0x2] %vm863_vm10, %v862_v39  ;;  %v944_v25 = vsel %vm3332_vm13, %v927_v38, -1e+30  ;;  %vm3349_vm10 = vmmov %vm3330_vm3  ;;  %vm743_vm13 = vcmask 32768  }
 0x253   : > { %v739_v21 = vmax.f32 %v737_v57, %v738_v2  ;;  %v971_v19 = vsel %vm3347_vm4, %v944_v25, -inf  ;;  %v1081_v58 = vsel %vm3349_vm10, %v1059_v43, -inf  ;;  %vm3350_vm4 = vmmov %vm3330_vm3  ;;  %vm1103_vm10 = vcmask 35843  }
 0x254   : > { %v975_v22 = vmax.f32 %v971_v19, %v974_v45  ;;  %v1088_v41 = vmax.f32 %v1081_v58, %v1094_v49 }
 0x255   : > { %v740_v52 = vrot.slane %v739_v21, 1 }
 0x256   : > { %v976_v27 = vrot.slane %v975_v22, 4  ;;  %v1093_v20 = vmax.f32 %v1089_v34, %v1088_v41 }
 0x257   : > { %v741_v61 = vmax.f32 %v739_v21, %v740_v52 }
 0x258   : > { %v977_v46 = vmax.f32 %v975_v22, %v976_v27  ;;  %v2177_v22 = vmov 0.0  }
 0x259   : > { %v742_v60 = vmax.f32 %v607_v35, %v741_v61  ;;  %v1867_v54 = vsel %vm2635_vm2, 1.0, %v2177_v22  ;;  %v1868_v58 = vsel %vm2623_vm1, 1.0, %v2177_v22  ;;  %v1870_v27 = vsel %vm2594_vm15, 1.0, %v2177_v22  ;;  %vm3355_vm2 = vmmov %vm3330_vm3 }
 0x25a   : > { %v978_v63 = vrot.slane %v977_v46, 2  ;;  %v1039_v44 = vpop.permute.xlu1 %1038  ;;  %v1871_v49 = vsel %vm2576_vm14, 1.0, %v2177_v22  ;;  %vm3357_vm1 = vnez %v3304_v29  ;;  %v1876_v29 = vsel %vm2509_vm9, 1.0, %v2177_v22 }
 0x25b   : > { %744 = vst.msk [vmem:[#allocation2] sm:$0x1] %vm743_vm13, %v742_v60  ;;  %v1062_v33 = vsel %vm2462_vm5, %v1039_v44, -1e+30  ;;  %vm3351_vm13 = vmmov %vm3330_vm3  ;;  %v1872_v37 = vsel %vm3357_vm1, 1.0, %v2177_v22  ;;  %v1880_v10 = vsel %vm2462_vm5, 1.0, %v2177_v22  ;;  %v1262_v60 = vpop.permute.xlu2 %1261 }
 0x25c   : > { %v979_v57 = vmax.f32 %v977_v46, %v978_v63  ;;  %v1087_v4 = vsel %vm3350_vm4, %v1062_v33, -inf  ;;  %vm3353_vm4 = vmmov %vm3330_vm3  ;;  %v1881_v7 = vsel %vm3338_vm12, 1.0, %v2177_v22  ;;  %vm1426_vm12 = vcmask 31744  }
 0x25d   : > { %v1095_v6 = vmax.f32 %v1093_v20, %v1087_v4 }
 0x25e   : > { %v980_v39 = vrot.slane %v979_v57, 1 }
 0x25f   : > { %v1096_v26 = vrot.slane %v1095_v6, 4 }
 0x260   : > { %v981_v2 = vmax.f32 %v979_v57, %v980_v39 }
 0x261   : > { %v1097_v38 = vmax.f32 %v1095_v6, %v1096_v26 }
 0x262   : > { %v982_v24 = vmax.f32 %v607_v35, %v981_v2 }
 0x263   : > { %v1098_v45 = vrot.slane %v1097_v38, 2  ;;  %v1259_v8 = vpop.permute.xlu1 %1258  ;;  %v1268_v26 = vpop.permute.xlu2 %1267 }
 0x264   : > { %984 = vst.msk [vmem:[#allocation2] sm:$0x4] %vm983_vm11, %v982_v24  ;;  %vm3354_vm11 = vmmov %vm3330_vm3 }
 0x265   : > { %v1099_v16 = vmax.f32 %v1097_v38, %v1098_v45 }
 0x267   : > { %v1100_v25 = vrot.slane %v1099_v16, 1 }
 0x269   : > { %v1101_v32 = vmax.f32 %v1099_v16, %v1100_v25 }
 0x26b   : > { %v1102_v43 = vmax.f32 %v607_v35, %v1101_v32  ;;  %v1265_v57 = vpop.permute.xlu1 %1264 }
 0x26d   : > { %1104 = vst.msk [vmem:[#allocation2] sm:$0x8] %vm1103_vm10, %v1102_v43  ;;  %vm3356_vm10 = vmmov %vm3355_vm2 }
 0x274   : > { %v1105_v21 = vld [vmem:[#allocation2] sm:$0xf] }
 0x275   : > { %v1106_v19 = vsub.f32 %v607_v35, %v1105_v21  ;;  %1899 = vmatpush.xpose.msk.msra.mxu1 %vm3351_vm13, %v1105_v21  ;;  %v1869_v35 = vsel %vm2609_vm0, 1.0, %v2177_v22  ;;  %vm3358_vm13 = vmmov %vm3355_vm2 }
 0x276   : > { %vm3360_vm0 = vmmov %vm3355_vm2 }
 0x277   : > { %v1107_v1 = vmul.f32 1.442695, %v1106_v19  ;;  %vm3362_vm15 = vmmov %vm3360_vm0  ;;  %v1274_v19 = vpop.permute.xlu1 %1273 }
 0x278   : > { %1900 = vmatmul.msk.f32.vlgmr.msra.gmra.mxu1 %vm3330_vm3, %v1867_v54  ;;  %vm3359_vm3 = vnez %v3302_v28  ;;  %vm3364_vm14 = vmmov %vm3360_vm0  ;;  %v1877_v28 = vsel %vm2501_vm8, 1.0, %v2177_v22  ;;  %vm1475_vm8 = vcmask 1043456  }
 0x279   : > { %2092 = vpow2.f32 %v1107_v1  ;;  %v1873_v31 = vsel %vm3359_vm3, 1.0, %v2177_v22  ;;  %vm3367_vm1 = vmmov %vm3360_vm0  ;;  %1932 = vmatpush.msk.msra.mxu3 %vm1475_vm8, %v3188_v9  ;;  %vm1305_vm3 = vcmp.eq.s32.totalorder %v1259_v8, 1 }
 0x27a   : > { %vm3369_vm9 = vmmov %vm3360_vm0 }
 0x27b   : > { %vm3372_vm5 = vmmov %vm3360_vm0 }
 0x27f   : > { %v3143_v52 = vpop.eup %2092 }
 0x280   : > { %1901 = vmatmul.msk.f32.gmra.mxu1 %vm3353_vm4, %v1868_v58  ;;  %1608 = vxpose.xlu2.b32.start.end [1/1] (short) (narrow) %v3143_v52, 8  ;;  %vm3361_vm4 = vnez %v3300_v12  ;;  %v1878_v12 = vsel %vm2481_vm7, 1.0, %v2177_v22  ;;  %vm3371_vm7 = vnez %v3331_v55  ;;  %v1277_v58 = vpop.permute.xlu2 %1276 }
 0x281   : > { %v1874_v13 = vsel %vm3361_vm4, 1.0, %v2177_v22  ;;  %v1882_v5 = vsel %vm3371_vm7, 1.0, %v2177_v22  ;;  %vm1307_vm4 = vcmp.eq.s32.totalorder %v1265_v57, 1 }
 0x288   : > { %1902 = vmatmul.msk.f32.gmra.mxu1 %vm3354_vm11, %v1869_v35  ;;  %vm3363_vm11 = vnez %v3298_v11  ;;  %v1879_v11 = vsel %vm2470_vm6, 1.0, %v2177_v22  ;;  %vm3370_vm6 = vmmov %vm3360_vm0 }
 0x289   : > { %v1875_v30 = vsel %vm3363_vm11, 1.0, %v2177_v22 }
 0x290   : > { %1903 = vmatmul.msk.f32.gmra.mxu1 %vm3355_vm2, %v1870_v27  ;;  %vm3365_vm2 = vmmov %vm3360_vm0 }
 0x298   : > { %1904 = vmatmul.msk.f32.gmra.mxu1 %vm3356_vm10, %v1871_v49  ;;  %vm3366_vm10 = vmmov %vm3360_vm0 }
 0x2a0   : > { %1905 = vmatmul.msk.f32.gmra.mxu1 %vm3358_vm13, %v1872_v37  ;;  %vm3368_vm13 = vmmov %vm3360_vm0 }
 0x2a8   : > { %1906 = vmatmul.msk.f32.gmra.mxu1 %vm3360_vm0, %v1873_v31  ;;  %vm1306_vm0 = vcmp.eq.s32.totalorder %v1262_v60, 1  ;;  %v1280_v31 = vpop.permute.xlu1 %1279 }
 0x2b0   : > { %1907 = vmatmul.msk.f32.gmra.mxu1 %vm3362_vm15, %v1874_v13  ;;  %vm1308_vm15 = vcmp.eq.s32.totalorder %v1268_v26, 1  ;;  %v1289_v60 = vpop.permute.xlu1 %1288 }
 0x2b8   : > { %1908 = vmatmul.msk.f32.gmra.mxu1 %vm3364_vm14, %v1875_v30  ;;  %vm1310_vm14 = vcmp.eq.s32.totalorder %v1274_v19, 1 }
 0x2c0   : > { %1909 = vmatmul.msk.f32.gmra.mxu1 %vm3365_vm2, %v1876_v29  ;;  %vm1311_vm2 = vcmp.eq.s32.totalorder %v1277_v58, 1 }
 0x2c8   : > { %1910 = vmatmul.msk.f32.gmra.mxu1 %vm3366_vm10, %v1877_v28  ;;  %vm1312_vm10 = vcmp.eq.s32.totalorder %v1280_v31, 1 }
 0x2d0   : > { %1911 = vmatmul.msk.f32.gmra.mxu1 %vm3367_vm1, %v1878_v12  ;;  %v1283_v12 = vpop.permute.xlu2 %1282 }
 0x2d1   : > { %vm1313_vm1 = vcmp.eq.s32.totalorder %v1283_v12, 1 }
 0x2d8   : > { %1912 = vmatmul.msk.f32.gmra.mxu1 %vm3368_vm13, %v1879_v11 }
 0x2e0   : > { %1913 = vmatmul.msk.f32.gmra.mxu1 %vm3369_vm9, %v1880_v10  ;;  %vm1315_vm9 = vcmp.eq.s32.totalorder %v1289_v60, 1 }
 0x2e8   : > { %1914 = vmatmul.msk.f32.gmra.mxu1 %vm3370_vm6, %v1881_v7 }
 0x2f0   : > { %1915 = vmatmul.msk.f32.gmra.mxu1 %vm3372_vm5, %v1882_v5 }
 0x2f5   : > { %v1177_v61 = vpop.f32.mrf.mxu1 }
 0x2f6   : > { %v1225_v34 = vsub.f32 %v2422_v47, %v1177_v61 }
 0x2f8   : > { %v1321_v46 = vsel %vm1305_vm3, %v1225_v34, -1e+30 }
 0x2f9   : > { %v1337_v41 = vmul.f32 1.442695, %v1321_v46 }
 0x2fb   : > { %2094 = vpow2.f32 %v1337_v41 }
 0x2fd   : > { %v1180_v63 = vpop.f32.mrf.mxu1 }
 0x2fe   : > { %v1226_v40 = vsub.f32 %v2427_v53, %v1180_v63 }
 0x300   : > { %v1322_v44 = vsel %vm1306_vm0, %v1226_v40, -1e+30 }
 0x301   : > { %v2095_v20 = vpop.eup %2094  ;;  %v1339_v55 = vmul.f32 1.442695, %v1322_v44 }
 0x302   : > { %1371 = vxpose.xlu1.b32.start [1/16] (narrow) %v2095_v20, 8  ;;  %1933 = vmatmul.msk.f32.vlgmr.msra.gmra.mxu3 %vm1426_vm12, %v2095_v20 }
 0x303   : > { %2096 = vpow2.f32 %v1339_v55  ;;  %v1292_v55 = vpop.permute.xlu2 %1291 }
 0x304   : > { %vm1316_vm6 = vcmp.eq.s32.totalorder %v1292_v55, 1 }
 0x305   : > { %v1183_v33 = vpop.f32.mrf.mxu1 }
 0x306   : > { %v1227_v47 = vsub.f32 %v2437_v62, %v1183_v33  ;;  %v1271_v62 = vpop.permute.xlu0 %1270 }
 0x307   : > { %vm1309_vm11 = vcmp.eq.s32.totalorder %v1271_v62, 1 }
 0x308   : > { %v1323_v4 = vsel %vm1307_vm4, %v1227_v47, -1e+30  ;;  %vm1424_vm4 = vcmask 35840  }
 0x309   : > { %v2097_v6 = vpop.eup %2096  ;;  %v1341_v39 = vmul.f32 1.442695, %v1323_v4 }
 0x30a   : > { %1372 = vxpose.xlu1.b32.cont [2/16] (narrow) %v2097_v6, 8  ;;  %1934 = vmatmul.msk.f32.gmra.mxu3 %vm1426_vm12, %v2097_v6 }
 0x30b   : > { %2098 = vpow2.f32 %v1341_v39 }
 0x30d   : > { %v1186_v53 = vpop.f32.mrf.mxu1 }
 0x30e   : > { %v1228_v2 = vsub.f32 %v2534_v15, %v1186_v53  ;;  %v1286_v8 = vpop.permute.xlu0 %1285 }
 0x30f   : > { %vm1314_vm13 = vcmp.eq.s32.totalorder %v1286_v8, 1 }
 0x310   : > { %v1324_v38 = vsel %vm1308_vm15, %v1228_v2, -1e+30  ;;  %vm1718_vm15 = vcmask 126976  }
 0x311   : > { %v2099_v24 = vpop.eup %2098  ;;  %v1343_v45 = vmul.f32 1.442695, %v1324_v38  ;;  %v1298_v38 = vpop.permute.xlu1 %1297 }
 0x312   : > { %1373 = vxpose.xlu1.b32.cont [3/16] (narrow) %v2099_v24, 8  ;;  %1935 = vmatmul.msk.f32.gmra.mxu3 %vm1426_vm12, %v2099_v24  ;;  %vm1318_vm5 = vcmp.eq.s32.totalorder %v1298_v38, 1 }
 0x313   : > { %2100 = vpow2.f32 %v1343_v45 }
 0x315   : > { %v1189_v16 = vpop.f32.mrf.mxu1 }
 0x316   : > { %v1229_v25 = vsub.f32 %v3329_v50, %v1189_v16  ;;  %v1295_v6 = vpop.permute.xlu0 %1294 }
 0x317   : > { %vm1317_vm7 = vcmp.eq.s32.totalorder %v1295_v6, 1 }
 0x318   : > { %v1325_v32 = vsel %vm1309_vm11, %v1229_v25, -1e+30  ;;  %v1301_v25 = vpop.permute.xlu2 %1300 }
 0x319   : > { %v2101_v43 = vpop.eup %2100  ;;  %v1345_v21 = vmul.f32 1.442695, %v1325_v32  ;;  %vm1319_vm3 = vcmp.eq.s32.totalorder %v1301_v25, 1  ;;  %v1569_v58 = vpop.permute.xlu1 %1568  ;;  %v1369_v25 = vld [vmem:[#allocation3] sm:$0xf] }
 0x31a   : > { %1374 = vxpose.xlu1.b32.cont [4/16] (narrow) %v2101_v43, 8  ;;  %1936 = vmatmul.msk.f32.gmra.mxu3 %vm1426_vm12, %v2101_v43 }
 0x31b   : > { %2102 = vpow2.f32 %v1345_v21 }
 0x31d   : > { %v1192_v15 = vpop.f32.mrf.mxu1 }
 0x31e   : > { %v1230_v1 = vsub.f32 %v2661_v17, %v1192_v15  ;;  %v1304_v19 = vpop.permute.xlu0 %1303 }
 0x31f   : > { %vm1320_vm0 = vcmp.eq.s32.totalorder %v1304_v19, 1 }
 0x320   : > { %v1326_v22 = vsel %vm1310_vm14, %v1230_v1, -1e+30 }
 0x321   : > { %v2103_v42 = vpop.eup %2102  ;;  %v1347_v54 = vmul.f32 1.442695, %v1326_v22 }
 0x322   : > { %1375 = vxpose.xlu1.b32.cont [5/16] (narrow) %v2103_v42, 8  ;;  %1937 = vmatmul.msk.f32.gmra.mxu3 %vm1426_vm12, %v2103_v42 }
 0x323   : > { %2104 = vpow2.f32 %v1347_v54 }
 0x325   : > { %v1195_v50 = vpop.f32.mrf.mxu1 }
 0x326   : > { %v1231_v35 = vsub.f32 %v2605_v36, %v1195_v50  ;;  %v1571_v8 = vpop.permute.xlu0 %1570 }
 0x328   : > { %v1327_v27 = vsel %vm1311_vm2, %v1231_v35, -1e+30 }
 0x329   : > { %v2105_v49 = vpop.eup %2104  ;;  %v1349_v37 = vmul.f32 1.442695, %v1327_v27  ;;  %v1563_v27 = vpop.permute.xlu1 %1562 }
 0x32a   : > { %1376 = vxpose.xlu1.b32.cont [6/16] (narrow) %v2105_v49, 8  ;;  %1938 = vmatmul.msk.f32.gmra.mxu3 %vm1426_vm12, %v2105_v49 }
 0x32b   : > { %2106 = vpow2.f32 %v1349_v37  ;;  %v1573_v37 = vpop.permute.xlu2 %1572 }
 0x32d   : > { %v1198_v17 = vpop.f32.mrf.mxu1 }
 0x32e   : > { %v1232_v13 = vsub.f32 %v2676_v18, %v1198_v17 }
 0x330   : > { %v1328_v30 = vsel %vm1312_vm10, %v1232_v13, -1e+30 }
 0x331   : > { %v2107_v29 = vpop.eup %2106  ;;  %v1351_v28 = vmul.f32 1.442695, %v1328_v30  ;;  %v1575_v17 = vpop.permute.xlu1 %1574 }
 0x332   : > { %1377 = vxpose.xlu1.b32.cont [7/16] (narrow) %v2107_v29, 8  ;;  %1939 = vmatmul.msk.f32.gmra.mxu3 %vm1426_vm12, %v2107_v29 }
 0x333   : > { %2108 = vpow2.f32 %v1351_v28  ;;  %v1567_v31 = vpop.permute.xlu2 %1566 }
 0x335   : > { %v1201_v36 = vpop.f32.mrf.mxu1 }
 0x336   : > { %v1233_v11 = vsub.f32 %v2697_v56, %v1201_v36 }
 0x338   : > { %v1329_v10 = vsel %vm1313_vm1, %v1233_v11, -1e+30 }
 0x339   : > { %v2109_v7 = vpop.eup %2108  ;;  %v1353_v5 = vmul.f32 1.442695, %v1329_v10 }
 0x33a   : > { %1378 = vxpose.xlu1.b32.cont [8/16] (narrow) %v2109_v7, 8  ;;  %1940 = vmatmul.msk.f32.gmra.mxu3 %vm1426_vm12, %v2109_v7 }
 0x33b   : > { %2110 = vpow2.f32 %v1353_v5  ;;  %v1561_v29 = vpop.permute.xlu2 %1560 }
 0x33d   : > { %v1204_v18 = vpop.f32.mrf.mxu1 }
 0x33e   : > { %v1234_v61 = vsub.f32 %v2679_v48, %v1204_v18 }
 0x340   : > { %v1330_v34 = vsel %vm1314_vm13, %v1234_v61, -1e+30 }
 0x341   : > { %v2111_v46 = vpop.eup %2110  ;;  %v1355_v41 = vmul.f32 1.442695, %v1330_v34 }
 0x342   : > { %1379 = vxpose.xlu1.b32.cont [9/16] (narrow) %v2111_v46, 8  ;;  %1941 = vmatmul.msk.f32.gmra.mxu3 %vm1426_vm12, %v2111_v46 }
 0x343   : > { %2112 = vpow2.f32 %v1355_v41  ;;  %v1557_v36 = vpop.permute.xlu2 %1556 }
 0x345   : > { %v1207_v56 = vpop.f32.mrf.mxu1 }
 0x346   : > { %v1235_v63 = vsub.f32 %v2688_v51, %v1207_v56  ;;  %v1565_v56 = vpop.permute.xlu0 %1564 }
 0x348   : > { %v1331_v40 = vsel %vm1315_vm9, %v1235_v63, -1e+30 }
 0x349   : > { %v2113_v44 = vpop.eup %2112  ;;  %v1357_v20 = vmul.f32 1.442695, %v1331_v40 }
 0x34a   : > { %1380 = vxpose.xlu1.b32.cont [10/16] (narrow) %v2113_v44, 8  ;;  %1942 = vmatmul.msk.f32.gmra.mxu3 %vm1426_vm12, %v2113_v44 }
 0x34b   : > { %2114 = vpow2.f32 %v1357_v20  ;;  %v1553_v34 = vpop.permute.xlu2 %1552 }
 0x34d   : > { %v1210_v48 = vpop.f32.mrf.mxu1 }
 0x34e   : > { %v1236_v33 = vsub.f32 %v2700_v59, %v1210_v48  ;;  %v1559_v63 = vpop.permute.xlu0 %1558 }
 0x350   : > { %v1332_v57 = vsel %vm1316_vm6, %v1236_v33, -1e+30 }
 0x351   : > { %v2115_v47 = vpop.eup %2114  ;;  %v1359_v4 = vmul.f32 1.442695, %v1332_v57 }
 0x352   : > { %1381 = vxpose.xlu1.b32.cont [11/16] (narrow) %v2115_v47, 8  ;;  %1943 = vmatmul.msk.f32.gmra.mxu3 %vm1426_vm12, %v2115_v47 }
 0x353   : > { %2116 = vpow2.f32 %v1359_v4  ;;  %v1624_v41 = vpop.trf.xlu2 }
 0x355   : > { %v1213_v51 = vpop.f32.mrf.mxu1 }
 0x356   : > { %v1237_v39 = vsub.f32 %v2709_v0, %v1213_v51  ;;  %v1555_v44 = vpop.permute.xlu0 %1554 }
 0x358   : > { %v1333_v53 = vsel %vm1317_vm7, %v1237_v39, -1e+30 }
 0x359   : > { %v2117_v26 = vpop.eup %2116  ;;  %v1361_v2 = vmul.f32 1.442695, %v1333_v53 }
 0x35a   : > { %1382 = vxpose.xlu1.b32.cont [12/16] (narrow) %v2117_v26, 8  ;;  %1944 = vmatmul.msk.f32.gmra.mxu3 %vm1426_vm12, %v2117_v26 }
 0x35b   : > { %2118 = vpow2.f32 %v1361_v2 }
 0x35d   : > { %v1216_v59 = vpop.f32.mrf.mxu1 }
 0x35e   : > { %v1238_v24 = vsub.f32 %v2720_v14, %v1216_v59  ;;  %v1551_v48 = vpop.permute.xlu0 %1550 }
 0x360   : > { %v1334_v45 = vsel %vm1318_vm5, %v1238_v24, -1e+30 }
 0x361   : > { %v2119_v62 = vpop.eup %2118  ;;  %v1363_v16 = vmul.f32 1.442695, %v1334_v45 }
 0x362   : > { %1383 = vxpose.xlu1.b32.cont [13/16] (narrow) %v2119_v62, 8  ;;  %1945 = vmatmul.msk.f32.gmra.mxu3 %vm1426_vm12, %v2119_v62 }
 0x363   : > { %2120 = vpow2.f32 %v1363_v16 }
 0x365   : > { %v1219_v0 = vpop.f32.mrf.mxu1 }
 0x366   : > { %v1239_v32 = vsub.f32 %v2749_v23, %v1219_v0  ;;  %v1549_v6 = vpop.permute.xlu0 %1548 }
 0x368   : > { %v1335_v43 = vsel %vm1319_vm3, %v1239_v32, -1e+30  ;;  %v1370_v32 = vmul.f32 %v3143_v52, %v1369_v25 }
 0x369   : > { %v2121_v21 = vpop.eup %2120  ;;  %v1365_v15 = vmul.f32 1.442695, %v1335_v43 }
 0x36a   : > { %1384 = vxpose.xlu1.b32.cont [14/16] (narrow) %v2121_v21, 8  ;;  %1946 = vmatmul.msk.f32.gmra.mxu3 %vm1426_vm12, %v2121_v21 }
 0x36b   : > { %2122 = vpow2.f32 %v1365_v15 }
 0x36d   : > { %v1222_v14 = vpop.f32.mrf.mxu1 }
 0x36e   : > { %v1240_v1 = vsub.f32 %v2772_v3, %v1222_v14  ;;  %v1547_v2 = vpop.permute.xlu0 %1546  ;;  %v1663_v14 = vld [vmem:[#allocation4] sm:$0x1f] }
 0x370   : > { %v1336_v22 = vsel %vm1320_vm0, %v1240_v1, -1e+30 }
 0x371   : > { %v2123_v42 = vpop.eup %2122  ;;  %v1367_v54 = vmul.f32 1.442695, %v1336_v22 }
 0x372   : > { %1385 = vxpose.xlu1.b32.cont [15/16] (narrow) %v2123_v42, 8  ;;  %1947 = vmatmul.msk.f32.gmra.mxu3 %vm1426_vm12, %v2123_v42 }
 0x373   : > { %2124 = vpow2.f32 %v1367_v54 }
 0x376   : > { %v1545_v16 = vpop.permute.xlu0 %1544 }
 0x379   : > { %v2125_v23 = vpop.eup %2124 }
 0x37a   : > { %1386 = vxpose.xlu1.b32.end [16/16] (narrow) %v2125_v23, 8  ;;  %1948 = vmatmul.msk.f32.gmra.mxu3 %vm1426_vm12, %v2125_v23 }
 0x385   : > { %v3230_v50 = vpop.f32.mrf.mxu3 }
 0x386   : > { %v1592_v0 = vmul.f32 %v1545_v16, %v3230_v50 }
 0x38d   : > { %v1499_v35 = vpop.f32.mrf.mxu3 }
 0x38e   : > { %v1593_v62 = vmul.f32 %v1547_v2, %v1499_v35 }
 0x395   : > { %v1502_v49 = vpop.f32.mrf.mxu3 }
 0x396   : > { %v1594_v45 = vmul.f32 %v1549_v6, %v1502_v49 }
 0x39d   : > { %v1505_v3 = vpop.f32.mrf.mxu3 }
 0x39e   : > { %v1595_v24 = vmul.f32 %v1551_v48, %v1505_v3 }
 0x3a5   : > { %v1508_v13 = vpop.f32.mrf.mxu3 }
 0x3a6   : > { %v1387_v30 = vpop.trf.xlu1  ;;  %v1596_v38 = vmul.f32 %v1553_v34, %v1508_v13 }
 0x3a7   : > { %1419 = vmatmul.f32.vlgmr.msra.gmra.mxu2 %v1387_v30 }
 0x3a8   : > { %1949 = vmatpush.msk.msra.mxu2 %vm1475_vm8, %v3188_v9 }
 0x3ad   : > { %v1511_v28 = vpop.f32.mrf.mxu3 }
 0x3ae   : > { %v1597_v59 = vmul.f32 %v1555_v44, %v1511_v28 }
 0x3af   : > { %1950 = vmatmul.msk.f32.vlgmr.msra.gmra.mxu2 %vm1426_vm12, %v1624_v41 }
 0x3b5   : > { %v1514_v12 = vpop.f32.mrf.mxu3 }
 0x3b6   : > { %v1598_v11 = vmul.f32 %v1557_v36, %v1514_v12 }
 0x3bd   : > { %v1517_v10 = vpop.f32.mrf.mxu3 }
 0x3be   : > { %v1599_v26 = vmul.f32 %v1559_v63, %v1517_v10 }
 0x3c5   : > { %v1520_v7 = vpop.f32.mrf.mxu3 }
 0x3c6   : > { %v1600_v5 = vmul.f32 %v1561_v29, %v1520_v7 }
 0x3cd   : > { %v1523_v18 = vpop.f32.mrf.mxu3 }
 0x3ce   : > { %v1601_v53 = vmul.f32 %v1563_v27, %v1523_v18 }
 0x3d5   : > { %v1526_v61 = vpop.f32.mrf.mxu3 }
 0x3d6   : > { %v1602_v39 = vmul.f32 %v1565_v56, %v1526_v61 }
 0x3dd   : > { %v1529_v46 = vpop.f32.mrf.mxu3 }
 0x3de   : > { %v1603_v51 = vmul.f32 %v1567_v31, %v1529_v46 }
 0x3e5   : > { %v1532_v60 = vpop.f32.mrf.mxu3 }
 0x3e6   : > { %v1604_v4 = vmul.f32 %v1569_v58, %v1532_v60 }
 0x3ed   : > { %v1535_v40 = vpop.f32.mrf.mxu3 }
 0x3ee   : > { %v1605_v47 = vmul.f32 %v1571_v8, %v1535_v40 }
 0x3f5   : > { %v1538_v20 = vpop.f32.mrf.mxu3 }
 0x3f6   : > { %v1606_v57 = vmul.f32 %v1573_v37, %v1538_v20 }
 0x3fd   : > { %v1541_v55 = vpop.f32.mrf.mxu3 }
 0x3fe   : > { %v1607_v33 = vmul.f32 %v1575_v17, %v1541_v55 }
 0x400   : > { %1697 = vmatpush.msra.mxu2 %v1607_v33 }
 0x402   : > { %1698 = vmatpush.msra.mxu2 %v1606_v57 }
 0x404   : > { %1699 = vmatpush.msra.mxu2 %v1605_v47 }
 0x406   : > { %1700 = vmatpush.msra.mxu2 %v1604_v4 }
 0x408   : > { %1701 = vmatpush.msra.mxu2 %v1603_v51 }
 0x40a   : > { %1702 = vmatpush.msra.mxu2 %v1602_v39 }
 0x40c   : > { %1703 = vmatpush.msra.mxu2 %v1601_v53 }
 0x40e   : > { %1704 = vmatpush.msra.mxu2 %v1600_v5 }
 0x410   : > { %1705 = vmatpush.msra.mxu2 %v1599_v26 }
 0x412   : > { %1706 = vmatpush.msra.mxu2 %v1598_v11 }
 0x414   : > { %1707 = vmatpush.msra.mxu2 %v1597_v59 }
 0x416   : > { %1708 = vmatpush.msra.mxu2 %v1596_v38 }
 0x418   : > { %1709 = vmatpush.msra.mxu2 %v1595_v24 }
 0x41a   : > { %1710 = vmatpush.msra.mxu2 %v1594_v45 }
 0x41c   : > { %1711 = vmatpush.msra.mxu2 %v1593_v62 }
 0x41e   : > { %1712 = vmatpush.msra.mxu2 %v1592_v0 }
 0x41f   : > { %1981 = vmatmul.lmr.bf16.vlgmr.msra.gmra.1.mxu2 }
 0x42a   : > { %v1420_v43 = vpop.f32.mrf.mxu2 }
 0x42b   : > { %v1423_v21 = vadd.f32 %v1420_v43, %v1370_v32 }
 0x42d   : > { %1425 = vst.msk [vmem:[#allocation3] sm:$0xf] %vm1424_vm4, %v1423_v21 }
 0x432   : > { %v1660_v15 = vpop.f32.mrf.mxu2 }
 0x433   : > { %v1664_v19 = vmul.f32 %v1663_v14, %v1660_v15 }
 0x4a1   : > { %1723 = sbr.rel (%p1951_p5) target bundleno = 1504 (0x5e0), region = 48 }
 0x4a2   : > { %v1714_v1 = vpop.f32.mrf.mxu2 }
 0x4a3   : > { %v1717_v22 = vadd.f32 %v1714_v1, %v1664_v19 }
 0x4a5   : > { %1719 = vst.msk [vmem:[#allocation4] sm:$0x1f] %vm1718_vm15, %v1717_v22 }
 0x4a6   : > { %v1724_v42 = vld [vmem:[#allocation3] sm:$0xf]  ;;  %1952 = vmatpush.msk.msra.mxu0 %vm1475_vm8, %v3188_v9 }
 0x4a7   : > { %1725 = vxpose.xlu0.b32.start.end [1/1] (short) (narrow) %v1724_v42, 8 }
 0x4ac   : > { %v1780_v17 = vld [vmem:[#allocation4] sm:$0x1f] }
 0x54b   : > { %v1741_v52 = vpop.trf.xlu0 }
 0x54c   : > { %1953 = vmatmul.msk.f32.vlgmr.msra.gmra.mxu0 %vm1426_vm12, %v1741_v52 }
 0x5c9   : > { %v1777_v54 = vpop.f32.mrf.mxu0 }
 0x5ca   : > { %v1781_v23 = vmax.f32 %v1777_v54, 1e-30 }
 0x5cc   : > { %2126 = vrcp.f32 %v1781_v23  ;;  %v1793_v27 = vand.u32 2147483648, %v1781_v23  ;;  %v1791_v37 = vand.u32 2147483647, %v1781_v23  ;;  %vm1787_vm14 = vweird.f32 %v1781_v23 }
 0x5ce   : > { %v1794_v31 = vor.u32 1.1754944e-38, %v1793_v27  ;;  %vm1792_vm8 = vcmp.eq.f32.partialorder %v1791_v37, 8.507059e+37 }
 0x5d2   : > { %v2127_v50 = vpop.eup %2126 }
 0x5d3   : > { %v1783_v58 = vmul.f32 %v2127_v50, %v1781_v23  ;;  %vm1788_vm11 = vweird.f32 %v2127_v50 }
 0x5d4   : > { %vm1789_vm2 = vmor %vm1787_vm14, %vm1788_vm11 }
 0x5d5   : > { %v1784_v35 = vsub.f32 1.0, %v1783_v58 }
 0x5d7   : > { %v1785_v49 = vmul.f32 %v2127_v50, %v1784_v35 }
 0x5d9   : > { %v1786_v3 = vadd.f32 %v2127_v50, %v1785_v49 }
 0x5db   : > { %v1790_v9 = vsel %vm1789_vm2, %v2127_v50, %v1786_v3 }
 0x5dc   : > { %v1795_v13 = vsel %vm1792_vm8, %v1794_v31, %v1790_v9 }
 0x5dd   : > { %v1796_v30 = vmul.f32 %v1795_v13, %v1780_v17 }
 0x5df   : > { %1797 = vst.msk [vmem:[#allocation5] sm:$0x1f] %vm1718_vm15, %v1796_v30 }
 0x5e0 PF: > { %p2002_p6 = scmp.eq.s32.totalorder %s2216_s19, 2  ;;  %s2178_s13 = smov [#allocation5]  }
 0x5e1   : > { %s1804_s14 = sshll.u32 %s2178_s13, 4  ;;  %s1806_s17 = sshll.u32 %s3255_s5, 4  ;;  %s1805_s14 = int_to_ptr.vmem [resolvable:$true] %s1804_s14  ;;  %s1807_s17 = int_to_ptr.hbm [resolvable:$true] %s1806_s17 }
 0x5e2   : > { %1999 = dma.vmem_to_hbm [thread:$0]  (%p2002_p6), %s1805_s14, 128, %s1807_s17, [#allocation6]  }
 0x5e3   : > { %2161 = dma.done.wait (%p2002_p6), [#allocation6], 128  }
 0x5e4   : > { %2163 = vsyncadd (%p2002_p6), [#allocation6], 4294967168 }
 0x5e5 PF: > { %s16_s18 = sadd.s32 1, %s2166_s18  }
 0x5e6   : > { %p13_p7 = scmp.ge.s32.totalorder %s16_s18, 5  }
 0x5e8   :  { %15 = sbr.rel (!%p13_p7) target bundleno = 1 (0x1), region = 78 }
 0x5ed   :  { %1820 = vsyncpa [#allocation6], 1 }
 0x5ee   :  { %1822 = vsyncpa [#allocation6 + $0x1], 1 }

</bundles_post_ra>
